<compile_context>
chip_gen: v5e
topology: v5e:2x2
jax: 0.10.0
libtpu: 0.0.40
codegen_flags: <defaults>
</compile_context>

<pallas_src>
import jax
import jax.numpy as jnp
from jax.experimental import pallas as pl
from jax.experimental.pallas import tpu as pltpu

# ---- static problem sizes (small, consistent with the module) ----------------
BATCH     = 256         # demo batch (>= TB so the grid actually iterates)
IN_DIM    = 32          # input_dims = (32,)
HIDDEN    = 128
N_ACTIONS = 4
ATOM_SIZE = 64          # C51-style categorical support (64 atoms here)
AZ        = N_ACTIONS * ATOM_SIZE
OUT_PAD   = 128         # lane-dense padded output width (multiple of 128)
TB        = 128         # batch rows per grid step (v5e MXU geometry; sweep 256 on v6e/v7x)

ACT_SHIFT = ATOM_SIZE.bit_length() - 1
assert (1 << ACT_SHIFT) == ATOM_SIZE, "atom_size must be a power of two"


def cdqn_kernel(x_ref, w1_ref, b1_ref, w2_ref, b2_ref, w3_ref, b3_ref,
                sup_ref, q_ref):
    # --- MLP: bf16 operands on the MXU, f32 accumulation (x cast in-kernel) ----
    x = x_ref[...].astype(jnp.bfloat16)
    h1 = jnp.dot(x, w1_ref[...], preferred_element_type=jnp.float32) + b1_ref[...]
    h1 = jnp.maximum(h1, 0.0)
    h2 = jnp.dot(h1.astype(jnp.bfloat16), w2_ref[...],
                 preferred_element_type=jnp.float32) + b2_ref[...]
    h2 = jnp.maximum(h2, 0.0)
    logits = jnp.dot(h2.astype(jnp.bfloat16), w3_ref[...],
                     preferred_element_type=jnp.float32) + b3_ref[...]        # (TB, A*Z) f32

    # --- per-action softmax without lane slicing --------------------------------
    # softmax is shift-invariant -> one row-global max, one exp pass over (TB, A*Z).
    m = jnp.max(logits, axis=-1, keepdims=True)
    e = jnp.exp(logits - m)                                                    # (TB, A*Z) f32

    # Block-diagonal 0/1 ones matrix built in-kernel (exact in bf16, no HBM bytes);
    # per-segment sums broadcast back to every atom via a single bf16 MXU pass.
    r_act = jnp.right_shift(jax.lax.broadcasted_iota(jnp.int32, (AZ, AZ), 0), ACT_SHIFT)
    c_act = jnp.right_shift(jax.lax.broadcasted_iota(jnp.int32, (AZ, AZ), 1), ACT_SHIFT)
    ones_blk = (r_act == c_act).astype(jnp.bfloat16)                           # (A*Z, A*Z)
    s = jnp.dot(e.astype(jnp.bfloat16), ones_blk,
                preferred_element_type=jnp.float32)                           # (TB, A*Z)
    # Guard: if an entire segment's exp() underflowed (logits >> below row max),
    # s would be 0 and the reciprocal would produce inf/NaN.  Floor it.
    s = jnp.maximum(s, 1e-30)

    # Reciprocal on the EUP slot; one Newton step restores full f32 accuracy.
    inv = pl.reciprocal(s, approx=True)
    inv = inv * (2.0 - s * inv)
    dist = jnp.maximum(e * inv, 0.001)          # clamp(min=0.001), no renormalization

    # Q for all actions with one lane-dense (TB, 128) store.  The support is kept
    # in f32 (bf16 support would blow the tolerance); the action-column scatter is
    # built in-kernel from iota compares + the (A*Z,1) f32 support column.
    ra = jnp.right_shift(jax.lax.broadcasted_iota(jnp.int32, (AZ, OUT_PAD), 0), ACT_SHIFT)
    ca = jax.lax.broadcasted_iota(jnp.int32, (AZ, OUT_PAD), 1)
    seg_sup = jnp.where(ra == ca, sup_ref[...], jnp.float32(0.0))              # (A*Z, 128) f32
    q_ref[...] = jnp.dot(dist, seg_sup, preferred_element_type=jnp.float32)


def prepare_params(w1, b1, w2, b2, w3, b3, support):
    """One-time parameter prep: bf16 MXU weights + f32 support column (A*Z, 1)."""
    sup_col = jnp.tile(support.reshape(1, ATOM_SIZE),
                       (N_ACTIONS, 1)).reshape(AZ, 1).astype(jnp.float32)
    return (w1.astype(jnp.bfloat16), b1.astype(jnp.float32),
            w2.astype(jnp.bfloat16), b2.astype(jnp.float32),
            w3.astype(jnp.bfloat16), b3.astype(jnp.float32),
            sup_col)


@jax.jit
def categorical_dqn_forward(x, params):
    w1b, b1, w2b, b2, w3b, b3, sup_col = params
    B = x.shape[0]
    Bp = ((B + TB - 1) // TB) * TB
    if Bp != B:
        x = jnp.pad(x, ((0, Bp - B), (0, 0)))

    def const(shape):  # VMEM-resident across grid steps (DMA'd once)
        return pl.BlockSpec(shape, lambda i: (0, 0))

    q_pad = pl.pallas_call(
        cdqn_kernel,
        out_shape=jax.ShapeDtypeStruct((Bp, OUT_PAD), jnp.float32),
        grid=(Bp // TB,),
        in_specs=[
            pl.BlockSpec((TB, IN_DIM), lambda i: (i, 0)),   # x: blocked over batch
            const((IN_DIM, HIDDEN)),                        # w1
            const((1, HIDDEN)),                             # b1
            const((HIDDEN, HIDDEN)),                        # w2
            const((1, HIDDEN)),                             # b2
            const((HIDDEN, AZ)),                            # w3
            const((1, AZ)),                                 # b3
            const((AZ, 1)),                                 # support column
        ],
        out_specs=pl.BlockSpec((TB, OUT_PAD), lambda i: (i, 0)),
        compiler_params=pltpu.CompilerParams(
            dimension_semantics=("parallel",)),             # megacore split on v7x
    )(x, w1b, b1, w2b, b2, w3b, b3, sup_col)
    # TODO(synk): downstream consumers could take the padded (B,128) slab directly
    # and fold this slice into their own op.
    return q_pad[:B, :N_ACTIONS]


# ---- references ---------------------------------------------------------------
def _reference_f32(x, w1, b1, w2, b2, w3, b3, support):
    """Exact f32 equivalent of the PyTorch module's forward."""
    h1 = jax.nn.relu(x @ w1 + b1)
    h2 = jax.nn.relu(h1 @ w2 + b2)
    q_atoms = (h2 @ w3 + b3).reshape(-1, N_ACTIONS, ATOM_SIZE)
    dist = jnp.clip(jax.nn.softmax(q_atoms, axis=-1), 0.001, None)
    return jnp.sum(dist * support.reshape(1, 1, ATOM_SIZE), axis=2)


def _reference_kernel_precision(x, w1, b1, w2, b2, w3, b3, support):
    """Matches the kernel's arithmetic: bf16 MXU operands, row-global max,
    bf16 segment-sum matmul, f32 support weighting."""
    f32, bf16 = jnp.float32, jnp.bfloat16
    h1 = jax.nn.relu(jnp.dot(x.astype(bf16), w1.astype(bf16),
                             preferred_element_type=f32) + b1)
    h2 = jax.nn.relu(jnp.dot(h1.astype(bf16), w2.astype(bf16),
                             preferred_element_type=f32) + b2)
    logits = jnp.dot(h2.astype(bf16), w3.astype(bf16),
                     preferred_element_type=f32) + b3
    m = jnp.max(logits, axis=-1, keepdims=True)
    e = jnp.exp(logits - m)
    act = jnp.arange(AZ) // ATOM_SIZE
    ones_blk = (act[:, None] == act[None, :]).astype(bf16)
    s = jnp.dot(e.astype(bf16), ones_blk, preferred_element_type=f32)
    dist = jnp.maximum(e / s, 0.001)
    sup_rep = jnp.tile(support.reshape(-1), N_ACTIONS)
    return (dist * sup_rep[None, :]).reshape(-1, N_ACTIONS, ATOM_SIZE).sum(-1)


if __name__ == "__main__":
    key = jax.random.PRNGKey(0)
    ks = jax.random.split(key, 8)

    # Deterministic parameter init (PyTorch Linear-style uniform +/- 1/sqrt(fan_in)).
    def uinit(k, shape, fan_in):
        bound = 1.0 / jnp.sqrt(jnp.float32(fan_in))
        return jax.random.uniform(k, shape, jnp.float32, -bound, bound)

    x  = jax.random.normal(ks[0], (BATCH, IN_DIM), jnp.float32)
    w1 = uinit(ks[1], (IN_DIM, HIDDEN), IN_DIM)
    b1 = uinit(ks[2], (1, HIDDEN), IN_DIM)
    w2 = uinit(ks[3], (HIDDEN, HIDDEN), HIDDEN)
    b2 = uinit(ks[4], (1, HIDDEN), HIDDEN)
    w3 = uinit(ks[5], (HIDDEN, AZ), HIDDEN)
    b3 = uinit(ks[6], (1, AZ), HIDDEN)
    support = jnp.linspace(-10.0, 10.0, ATOM_SIZE, dtype=jnp.float32).reshape(1, ATOM_SIZE)

    params = prepare_params(w1, b1, w2, b2, w3, b3, support)
    q = categorical_dqn_forward(x, params)
    q = jax.block_until_ready(q)
    assert q.shape == (BATCH, N_ACTIONS)

    # Tight check against a reference with matching (bf16-operand) arithmetic.
    q_ref_kp = _reference_kernel_precision(x, w1, b1, w2, b2, w3, b3, support)
    assert jnp.allclose(q, q_ref_kp, atol=5e-3, rtol=5e-3), (
        float(jnp.max(jnp.abs(q - q_ref_kp))))

    # Loose semantic check against the exact f32 module (bf16 rounding only).
    q_ref_f32 = _reference_f32(x, w1, b1, w2, b2, w3, b3, support)
    assert jnp.allclose(q, q_ref_f32, atol=5e-2, rtol=5e-2), (
        float(jnp.max(jnp.abs(q - q_ref_f32))))

    print("KERNEL_OK")
</pallas_src>

<mosaic_0001>
module attributes {stable_mosaic.version = 11 : i64} {
  func.func @cdqn_kernel(%arg0: i32, %arg1: memref<128x32xf32, #tpu.memory_space<vmem>>, %arg2: memref<32x128xbf16, #tpu.memory_space<vmem>>, %arg3: memref<1x128xf32, #tpu.memory_space<vmem>>, %arg4: memref<128x128xbf16, #tpu.memory_space<vmem>>, %arg5: memref<1x128xf32, #tpu.memory_space<vmem>>, %arg6: memref<128x256xbf16, #tpu.memory_space<vmem>>, %arg7: memref<1x256xf32, #tpu.memory_space<vmem>>, %arg8: memref<256x1xf32, #tpu.memory_space<vmem>>, %arg9: memref<128x128xf32, #tpu.memory_space<vmem>>) attributes {dimension_semantics = [#tpu.dimension_semantics<parallel>], iteration_bounds = array<i64: 2>, scalar_prefetch = 0 : i64, scratch_operands = 0 : i64, tpu.core_type = #tpu.core_type<tc>, window_params = [{transform_indices = @transform_0, window_bounds = array<i64: 128, 32>}, {pipeline_mode = #tpu.pipeline_mode<synchronous>, transform_indices = @transform_1, window_bounds = array<i64: 32, 128>}, {pipeline_mode = #tpu.pipeline_mode<synchronous>, transform_indices = @transform_2, window_bounds = array<i64: 1, 128>}, {pipeline_mode = #tpu.pipeline_mode<synchronous>, transform_indices = @transform_3, window_bounds = array<i64: 128, 128>}, {pipeline_mode = #tpu.pipeline_mode<synchronous>, transform_indices = @transform_4, window_bounds = array<i64: 1, 128>}, {pipeline_mode = #tpu.pipeline_mode<synchronous>, transform_indices = @transform_5, window_bounds = array<i64: 128, 256>}, {pipeline_mode = #tpu.pipeline_mode<synchronous>, transform_indices = @transform_6, window_bounds = array<i64: 1, 256>}, {pipeline_mode = #tpu.pipeline_mode<synchronous>, transform_indices = @transform_7, window_bounds = array<i64: 256, 1>}, {transform_indices = @transform_8, window_bounds = array<i64: 128, 128>}]} {
    %c0 = arith.constant 0 : index
    %c0_0 = arith.constant 0 : index
    %0 = vector.load %arg1[%c0, %c0_0] : memref<128x32xf32, #tpu.memory_space<vmem>>, vector<128x32xf32>
    %1 = arith.truncf %0 : vector<128x32xf32> to vector<128x32xbf16>
    %c0_1 = arith.constant 0 : index
    %c0_2 = arith.constant 0 : index
    %2 = vector.load %arg2[%c0_1, %c0_2] : memref<32x128xbf16, #tpu.memory_space<vmem>>, vector<32x128xbf16>
    %cst = arith.constant dense<0.000000e+00> : vector<128x128xf32>
    %3 = tpu.matmul %1, %2, %cst {dimension_numbers = #tpu.dot_dimension_numbers<[1], [0], [0], [1], [0, 0, 1, 1], [], []>} : vector<128x32xbf16>, vector<32x128xbf16>, vector<128x128xf32> -> vector<128x128xf32>
    %c0_3 = arith.constant 0 : index
    %c0_4 = arith.constant 0 : index
    %4 = vector.load %arg3[%c0_3, %c0_4] : memref<1x128xf32, #tpu.memory_space<vmem>>, vector<1x128xf32>
    %5 = vector.broadcast %4 : vector<1x128xf32> to vector<128x128xf32>
    %6 = arith.addf %3, %5 : vector<128x128xf32>
    %cst_5 = arith.constant 0.000000e+00 : f32
    %7 = vector.broadcast %cst_5 : f32 to vector<128x128xf32>
    %8 = arith.maximumf %6, %7 : vector<128x128xf32>
    %9 = arith.truncf %8 : vector<128x128xf32> to vector<128x128xbf16>
    %c0_6 = arith.constant 0 : index
    %c0_7 = arith.constant 0 : index
    %10 = vector.load %arg4[%c0_6, %c0_7] : memref<128x128xbf16, #tpu.memory_space<vmem>>, vector<128x128xbf16>
    %cst_8 = arith.constant dense<0.000000e+00> : vector<128x128xf32>
    %11 = tpu.matmul %9, %10, %cst_8 {dimension_numbers = #tpu.dot_dimension_numbers<[1], [0], [0], [1], [0, 0, 1, 1], [], []>} : vector<128x128xbf16>, vector<128x128xbf16>, vector<128x128xf32> -> vector<128x128xf32>
    %c0_9 = arith.constant 0 : index
    %c0_10 = arith.constant 0 : index
    %12 = vector.load %arg5[%c0_9, %c0_10] : memref<1x128xf32, #tpu.memory_space<vmem>>, vector<1x128xf32>
    %13 = vector.broadcast %12 : vector<1x128xf32> to vector<128x128xf32>
    %14 = arith.addf %11, %13 : vector<128x128xf32>
    %cst_11 = arith.constant 0.000000e+00 : f32
    %15 = vector.broadcast %cst_11 : f32 to vector<128x128xf32>
    %16 = arith.maximumf %14, %15 : vector<128x128xf32>
    %17 = arith.truncf %16 : vector<128x128xf32> to vector<128x128xbf16>
    %c0_12 = arith.constant 0 : index
    %c0_13 = arith.constant 0 : index
    %18 = vector.load %arg6[%c0_12, %c0_13] : memref<128x256xbf16, #tpu.memory_space<vmem>>, vector<128x256xbf16>
    %cst_14 = arith.constant dense<0.000000e+00> : vector<128x256xf32>
    %19 = tpu.matmul %17, %18, %cst_14 {dimension_numbers = #tpu.dot_dimension_numbers<[1], [0], [0], [1], [0, 0, 1, 1], [], []>} : vector<128x128xbf16>, vector<128x256xbf16>, vector<128x256xf32> -> vector<128x256xf32>
    %c0_15 = arith.constant 0 : index
    %c0_16 = arith.constant 0 : index
    %20 = vector.load %arg7[%c0_15, %c0_16] : memref<1x256xf32, #tpu.memory_space<vmem>>, vector<1x256xf32>
    %21 = vector.broadcast %20 : vector<1x256xf32> to vector<128x256xf32>
    %22 = arith.addf %19, %21 : vector<128x256xf32>
    %cst_17 = arith.constant dense<0xFF800000> : vector<128xf32>
    %23 = vector.multi_reduction <maximumf>, %22, %cst_17 [1] : vector<128x256xf32> to vector<128xf32>
    %24 = vector.shape_cast %23 : vector<128xf32> to vector<128x1xf32>
    %25 = vector.broadcast %24 : vector<128x1xf32> to vector<128x256xf32>
    %26 = arith.subf %22, %25 : vector<128x256xf32>
    %27 = math.exp %26 : vector<128x256xf32>
    %28 = tpu.iota {dimensions = array<i32: 0>} : vector<256x256xi32>
    %c6_i32 = arith.constant 6 : i32
    %29 = vector.broadcast %c6_i32 : i32 to vector<256x256xi32>
    %30 = arith.shrsi %28, %29 : vector<256x256xi32>
    %31 = tpu.iota {dimensions = array<i32: 1>} : vector<256x256xi32>
    %c6_i32_18 = arith.constant 6 : i32
    %32 = vector.broadcast %c6_i32_18 : i32 to vector<256x256xi32>
    %33 = arith.shrsi %31, %32 : vector<256x256xi32>
    %34 = arith.cmpi eq, %30, %33 : vector<256x256xi32>
    %35 = arith.extui %34 : vector<256x256xi1> to vector<256x256xi32>
    %36 = arith.sitofp %35 : vector<256x256xi32> to vector<256x256xf32>
    %37 = arith.truncf %36 : vector<256x256xf32> to vector<256x256xbf16>
    %38 = arith.truncf %27 : vector<128x256xf32> to vector<128x256xbf16>
    %cst_19 = arith.constant dense<0.000000e+00> : vector<128x256xf32>
    %39 = tpu.matmul %38, %37, %cst_19 {dimension_numbers = #tpu.dot_dimension_numbers<[1], [0], [0], [1], [0, 0, 1, 1], [], []>} : vector<128x256xbf16>, vector<256x256xbf16>, vector<128x256xf32> -> vector<128x256xf32>
    %cst_20 = arith.constant 1.000000e-30 : f32
    %40 = vector.broadcast %cst_20 : f32 to vector<128x256xf32>
    %41 = arith.maximumf %39, %40 : vector<128x256xf32>
    %42 = tpu.reciprocal %41 {approx = true} : vector<128x256xf32> -> vector<128x256xf32>
    %43 = arith.mulf %41, %42 : vector<128x256xf32>
    %cst_21 = arith.constant 2.000000e+00 : f32
    %44 = vector.broadcast %cst_21 : f32 to vector<128x256xf32>
    %45 = arith.subf %44, %43 : vector<128x256xf32>
    %46 = arith.mulf %42, %45 : vector<128x256xf32>
    %47 = arith.mulf %27, %46 : vector<128x256xf32>
    %cst_22 = arith.constant 1.000000e-03 : f32
    %48 = vector.broadcast %cst_22 : f32 to vector<128x256xf32>
    %49 = arith.maximumf %47, %48 : vector<128x256xf32>
    %50 = tpu.iota {dimensions = array<i32: 0>} : vector<256x128xi32>
    %c6_i32_23 = arith.constant 6 : i32
    %51 = vector.broadcast %c6_i32_23 : i32 to vector<256x128xi32>
    %52 = arith.shrsi %50, %51 : vector<256x128xi32>
    %53 = tpu.iota {dimensions = array<i32: 1>} : vector<256x128xi32>
    %54 = arith.cmpi eq, %52, %53 : vector<256x128xi32>
    %c0_24 = arith.constant 0 : index
    %c0_25 = arith.constant 0 : index
    %55 = vector.load %arg8[%c0_24, %c0_25] : memref<256x1xf32, #tpu.memory_space<vmem>>, vector<256x1xf32>
    %cst_26 = arith.constant 0.000000e+00 : f32
    %56 = vector.shape_cast %55 : vector<256x1xf32> to vector<256x1xf32>
    %57 = vector.broadcast %56 : vector<256x1xf32> to vector<256x128xf32>
    %58 = vector.broadcast %cst_26 : f32 to vector<256x128xf32>
    %59 = arith.select %54, %57, %58 : vector<256x128xi1>, vector<256x128xf32>
    %cst_27 = arith.constant dense<0.000000e+00> : vector<128x128xf32>
    %60 = tpu.matmul %49, %59, %cst_27 {dimension_numbers = #tpu.dot_dimension_numbers<[1], [0], [0], [1], [0, 0, 1, 1], [], []>} : vector<128x256xf32>, vector<256x128xf32>, vector<128x128xf32> -> vector<128x128xf32>
    %c0_28 = arith.constant 0 : index
    %c0_29 = arith.constant 0 : index
    %61 = vector.load %arg9[%c0_28, %c0_29] : memref<128x128xf32, #tpu.memory_space<vmem>>, vector<128x128xf32>
    tpu.vector_store %arg9[%c0_28, %c0_29], %60 {strides = array<i32>} : memref<128x128xf32, #tpu.memory_space<vmem>>, vector<128x128xf32>,
    return
  }
  func.func @transform_0(%arg0: i32) -> (i32, i32) {
    %c0_i32 = arith.constant 0 : i32
    %c0_i32_0 = arith.constant 0 : i32
    return %arg0, %c0_i32 : i32, i32
  }
  func.func @transform_1(%arg0: i32) -> (i32, i32) {
    %c0_i32 = arith.constant 0 : i32
    %c0_i32_0 = arith.constant 0 : i32
    %c0_i32_1 = arith.constant 0 : i32
    return %c0_i32, %c0_i32_0 : i32, i32
  }
  func.func @transform_2(%arg0: i32) -> (i32, i32) {
    %c0_i32 = arith.constant 0 : i32
    %c0_i32_0 = arith.constant 0 : i32
    %c0_i32_1 = arith.constant 0 : i32
    return %c0_i32, %c0_i32_0 : i32, i32
  }
  func.func @transform_3(%arg0: i32) -> (i32, i32) {
    %c0_i32 = arith.constant 0 : i32
    %c0_i32_0 = arith.constant 0 : i32
    %c0_i32_1 = arith.constant 0 : i32
    return %c0_i32, %c0_i32_0 : i32, i32
  }
  func.func @transform_4(%arg0: i32) -> (i32, i32) {
    %c0_i32 = arith.constant 0 : i32
    %c0_i32_0 = arith.constant 0 : i32
    %c0_i32_1 = arith.constant 0 : i32
    return %c0_i32, %c0_i32_0 : i32, i32
  }
  func.func @transform_5(%arg0: i32) -> (i32, i32) {
    %c0_i32 = arith.constant 0 : i32
    %c0_i32_0 = arith.constant 0 : i32
    %c0_i32_1 = arith.constant 0 : i32
    return %c0_i32, %c0_i32_0 : i32, i32
  }
  func.func @transform_6(%arg0: i32) -> (i32, i32) {
    %c0_i32 = arith.constant 0 : i32
    %c0_i32_0 = arith.constant 0 : i32
    %c0_i32_1 = arith.constant 0 : i32
    return %c0_i32, %c0_i32_0 : i32, i32
  }
  func.func @transform_7(%arg0: i32) -> (i32, i32) {
    %c0_i32 = arith.constant 0 : i32
    %c0_i32_0 = arith.constant 0 : i32
    %c0_i32_1 = arith.constant 0 : i32
    return %c0_i32, %c0_i32_0 : i32, i32
  }
  func.func @transform_8(%arg0: i32) -> (i32, i32) {
    %c0_i32 = arith.constant 0 : i32
    %c0_i32_0 = arith.constant 0 : i32
    return %arg0, %c0_i32 : i32, i32
  }
}

</mosaic_0001>

<bundles_post_ra>
// kernel: categorical_dqn_forward.1
= control target key start
LH: loop header
LB: loop body
LE: loop exit
PB: predicated region body
PF: predicated region fallthrough
CT: control target
= control target key end

     0   :  { %s2650_s27 = smov 0   ;;  %s3631_s0 = inlined_call_operand.vmem [shape: f32[256,32], index: 0, kind: input, shape index: {}]   ;;  %s3632_s1 = inlined_call_operand.vmem [shape: bf16[32,128], index: 1, kind: input, shape index: {}]   ;;  %s3633_s2 = inlined_call_operand.vmem [shape: f32[1,128], index: 2, kind: input, shape index: {}]   ;;  %s3634_s3 = inlined_call_operand.vmem [shape: bf16[128,128], index: 3, kind: input, shape index: {}]   ;;  %s3635_s4 = inlined_call_operand.vmem [shape: f32[1,128], index: 4, kind: input, shape index: {}]   ;;  %s3636_s5 = inlined_call_operand.vmem [shape: bf16[128,256], index: 5, kind: input, shape index: {}]   ;;  %s3637_s6 = inlined_call_operand.vmem [shape: f32[1,256], index: 6, kind: input, shape index: {}]   ;;  %s3638_s7 = inlined_call_operand.vmem [shape: f32[256,1], index: 7, kind: input, shape index: {}]   ;;  %s3639_s8 = inlined_call_operand.vmem [shape: f32[256,128], index: 8, kind: output, shape index: {}]  }
   0x1 LB: > { %s2125_s28 = sadd.s32 4294967295, %s2601_s27   ;;  %p2129_p0 = scmp.ge.s32.totalorder %s2601_s27, 1  ;;  %s2601_s27 = sphi %s2650_s27, %s18_s27  }
   0x2   : > { %p263_p1 = scmp.lt.s32.totalorder %s2601_s27, 3 }
   0x4   : > { %p264_p2 = pnand %p2129_p0, %p263_p1 }
   0x6   : > { %267 = sbr.rel (%p264_p2) target bundleno = 1067 (0x42b), region = 52 }
   0xb   : > { %v2409_v0 = vld [vmem:[%s3632_s1 + $0x8] sm:$0xff]  ;;  %s2130_s9 = sshll.u32 %s2125_s28, 4  ;;  %v2408_v1 = vld [vmem:[%s3632_s1] sm:$0xff]  ;;  %vm354_vm0 = vcmask 261120   ;;  %v2417_v14 = vld [vmem:[%s3634_s3 + $0x38] sm:$0xff] }
   0xc   : > { %p298_p3 = scmp.lt.s32.totalorder %s2130_s9, 31  ;;  %385 = vmatpush.bf16.msra.mxu0 %v2409_v0  ;;  %2434 = vmatpush.bf16.msra.mxu3 %v2409_v0  ;;  %v2416_v15 = vld [vmem:[%s3634_s3 + $0x30] sm:$0xff]  ;;  %v2415_v18 = vld [vmem:[%s3634_s3 + $0x28] sm:$0xff]  ;;  %v2414_v22 = vld [vmem:[%s3634_s3 + $0x20] sm:$0xff] }
   0xd   : > { %520 = vmatpush.bf16.msra.mxu1 %v2417_v14  ;;  %2436 = vmatpush.bf16.msra.mxu2 %v2417_v14  ;;  %v2413_v30 = vld [vmem:[%s3634_s3 + $0x18] sm:$0xff]  ;;  %v2412_v31 = vld [vmem:[%s3634_s3 + $0x10] sm:$0xff]  ;;  %v2411_v32 = vld [vmem:[%s3634_s3 + $0x8] sm:$0xff] }
   0xe   : > { %s3656_s9 = smov (!%p298_p3, %s2130_s9), 31  ;;  %v2410_v33 = vld [vmem:[%s3634_s3] sm:$0xff] }
   0xf   : > { %s2131_s12 = sshll.u32 %s3656_s9, 3  ;;  %v2725_v35 = vld [vmem:[%s3633_s2] ss:$0 sm:$0xff] }
  0x10   : > { %386 = vmatpush.bf16.msra.mxu0 %v2408_v1  ;;  %s2672_s15 = scalar_lea.vmem %s3631_s0, %s2131_s12  ;;  %2435 = vmatpush.bf16.msra.mxu3 %v2408_v1  ;;  %s3607_s16 = scalar_lea.vmem %s3639_s8, %s2131_s12 }
  0x11   : > { %v310_v2 = vld [vmem:[%s2672_s15] sm:$0xff]  ;;  %v311_v3 = vld [vmem:[%s2672_s15 + $0x8] sm:$0xff]  ;;  %v312_v5 = vld [vmem:[%s2672_s15 + $0x10] sm:$0xff]  ;;  %521 = vmatpush.bf16.msra.mxu1 %v2416_v15  ;;  %2438 = vmatpush.bf16.msra.mxu2 %v2416_v15 }
  0x12   : > { %v326_v4 = vpack.c.bf16 %v311_v3, %v310_v2  ;;  %v313_v6 = vld [vmem:[%s2672_s15 + $0x18] sm:$0xff]  ;;  %v314_v8 = vld [vmem:[%s2672_s15 + $0x20] sm:$0xff]  ;;  %v315_v9 = vld [vmem:[%s2672_s15 + $0x28] sm:$0xff] }
  0x13   : > { %v327_v7 = vpack.c.bf16 %v313_v6, %v312_v5  ;;  %v328_v10 = vpack.c.bf16 %v315_v9, %v314_v8  ;;  %v320_v11 = vld [vmem:[%s2672_s15 + $0x50] sm:$0xff]  ;;  %v321_v12 = vld [vmem:[%s2672_s15 + $0x58] sm:$0xff]  ;;  %v322_v20 = vld [vmem:[%s2672_s15 + $0x60] sm:$0xff] }
  0x14   : > { %2142 = vmatmul.msk.bf16.vlgmr.msra.gmra.mxu0 %vm354_vm0, %v326_v4  ;;  %v331_v13 = vpack.c.bf16 %v321_v12, %v320_v11  ;;  %2437 = vmatpush.bf16.msrb.mxu3 %v2417_v14  ;;  %v316_v16 = vld [vmem:[%s2672_s15 + $0x30] sm:$0xff]  ;;  %v317_v17 = vld [vmem:[%s2672_s15 + $0x38] sm:$0xff]  ;;  %v323_v21 = vld [vmem:[%s2672_s15 + $0x68] sm:$0xff] }
  0x15   : > { %v329_v19 = vpack.c.bf16 %v317_v17, %v316_v16  ;;  %522 = vmatpush.bf16.msra.mxu1 %v2415_v18  ;;  %2440 = vmatpush.bf16.msra.mxu2 %v2415_v18  ;;  %v332_v23 = vpack.c.bf16 %v323_v21, %v322_v20  ;;  %v318_v24 = vld [vmem:[%s2672_s15 + $0x40] sm:$0xff]  ;;  %v319_v25 = vld [vmem:[%s2672_s15 + $0x48] sm:$0xff]  ;;  %v324_v27 = vld [vmem:[%s2672_s15 + $0x70] sm:$0xff] }
  0x16   : > { %2147 = vmatmul.msk.bf16.vlgmr.msra.gmra.mxu3 %vm354_vm0, %v331_v13  ;;  %v330_v26 = vpack.c.bf16 %v319_v25, %v318_v24  ;;  %v325_v28 = vld [vmem:[%s2672_s15 + $0x78] sm:$0xff]  ;;  %v2240_v2 = vld [vmem:[%s3636_s5 + $0x70] sm:$0xf]  ;;  %v2232_v4 = vld [vmem:[%s3636_s5 + $0x60] sm:$0xf] }
  0x17   : > { %v333_v29 = vpack.c.bf16 %v325_v28, %v324_v27  ;;  %v2433_v3 = vld [vmem:[%s3636_s5 + $0x74] sm:$0xf0]  ;;  %v2432_v8 = vld [vmem:[%s3636_s5 + $0x74] sm:$0xf]  ;;  %v2430_v11 = vld [vmem:[%s3636_s5 + $0x64] sm:$0xf] }
  0x18   : > { %2439 = vmatpush.bf16.msrb.mxu3 %v2416_v15  ;;  %v2241_v6 = vor.u32 %v2433_v3, %v2240_v2  ;;  %v2224_v12 = vld [vmem:[%s3636_s5 + $0x50] sm:$0xf]  ;;  %v2429_v13 = vld [vmem:[%s3636_s5 + $0x54] sm:$0xf0]  ;;  %v2234_v15 = vld [vmem:[%s3636_s5 + $0x68] sm:$0xf0] }
  0x19   : > { %523 = vmatpush.bf16.msra.mxu1 %v2414_v22  ;;  %2442 = vmatpush.bf16.msra.mxu2 %v2414_v22  ;;  %v2237_v17 = vor.u32 %v2430_v11, %v2234_v15  ;;  %v2226_v20 = vld [vmem:[%s3636_s5 + $0x58] sm:$0xf0]  ;;  %v2427_v24 = vld [vmem:[%s3636_s5 + $0x44] sm:$0xf0]  ;;  %v2420_v2 = vld [vmem:[%s3636_s5 + $0x14] sm:$0xf] }
  0x1a   : > { %v2194_v3 = vld [vmem:[%s3636_s5 + $0x18] sm:$0xf0] }
  0x1c   : > { %2441 = vmatpush.bf16.msrb.mxu3 %v2415_v18  ;;  %v2225_v18 = vor.u32 %v2429_v13, %v2224_v12  ;;  %v2848_v12 = vld [vmem:[%s3635_s4] ss:$0 sm:$0xff] }
  0x1d   : > { %524 = vmatpush.bf16.msra.mxu1 %v2413_v30  ;;  %2444 = vmatpush.bf16.msra.mxu2 %v2413_v30 }
  0x20   : > { %2443 = vmatpush.bf16.msrb.mxu3 %v2414_v22 }
  0x21   : > { %525 = vmatpush.bf16.msra.mxu1 %v2412_v31  ;;  %2446 = vmatpush.bf16.msra.mxu2 %v2412_v31 }
  0x24   : > { %2143 = vmatmul.msk.bf16.gmra.mxu0 %vm354_vm0, %v327_v7  ;;  %2445 = vmatpush.bf16.msrb.mxu3 %v2413_v30  ;;  %v2431_v7 = vld [vmem:[%s3636_s5 + $0x64] sm:$0xf0] }
  0x25   : > { %526 = vmatpush.bf16.msra.mxu1 %v2411_v32  ;;  %2448 = vmatpush.bf16.msra.mxu2 %v2411_v32  ;;  %v2233_v9 = vor.u32 %v2431_v7, %v2232_v4  ;;  %v2197_v4 = vor.u32 %v2420_v2, %v2194_v3  ;;  %v2418_v7 = vld [vmem:[%s3636_s5 + $0x4] sm:$0xf] }
  0x26   : > { %2148 = vmatmul.msk.bf16.gmra.mxu3 %vm354_vm0, %v332_v23  ;;  %v2216_v23 = vld [vmem:[%s3636_s5 + $0x40] sm:$0xf] }
  0x28   : > { %2447 = vmatpush.bf16.msrb.mxu3 %v2412_v31  ;;  %v2217_v31 = vor.u32 %v2427_v24, %v2216_v23 }
  0x29   : > { %527 = vmatpush.bf16.msra.mxu1 %v2410_v33  ;;  %2450 = vmatpush.bf16.msra.mxu2 %v2410_v33 }
  0x2c   : > { %2449 = vmatpush.bf16.msrb.mxu3 %v2411_v32  ;;  %v2426_v32 = vld [vmem:[%s3636_s5 + $0x44] sm:$0xf] }
  0x2d   : > { %695 = vmatpush.bf16.msrb.mxu2 %v2241_v6  ;;  %v2419_v6 = vld [vmem:[%s3636_s5 + $0x4] sm:$0xf0] }
  0x30   : > { %2451 = vmatpush.bf16.msrb.mxu3 %v2410_v33  ;;  %v2218_v33 = vld [vmem:[%s3636_s5 + $0x48] sm:$0xf0] }
  0x31   : > { %696 = vmatpush.bf16.msrb.mxu2 %v2233_v9  ;;  %v2186_v9 = vld [vmem:[%s3636_s5 + $0x8] sm:$0xf0] }
  0x34   : > { %2144 = vmatmul.msk.bf16.gmra.mxu0 %vm354_vm0, %v328_v10  ;;  %v2242_v10 = vld [vmem:[%s3636_s5 + $0x78] sm:$0xf0] }
  0x35   : > { %v2245_v14 = vor.u32 %v2432_v8, %v2242_v10  ;;  %697 = vmatpush.bf16.msrb.mxu2 %v2225_v18  ;;  %v2189_v10 = vor.u32 %v2418_v7, %v2186_v9 }
  0x36   : > { %2149 = vmatmul.msk.bf16.gmra.mxu3 %vm354_vm0, %v333_v29 }
  0x37   : > { %744 = vmatpush.bf16.msra.mxu3 %v2245_v14 }
  0x39   : > { %698 = vmatpush.bf16.msrb.mxu2 %v2217_v31 }
  0x3b   : > { %745 = vmatpush.bf16.msra.mxu3 %v2237_v17 }
  0x44   : > { %2145 = vmatmul.msk.bf16.gmra.mxu0 %vm354_vm0, %v329_v19  ;;  %v2428_v19 = vld [vmem:[%s3636_s5 + $0x54] sm:$0xf] }
  0x45   : > { %v2229_v29 = vor.u32 %v2428_v19, %v2226_v20 }
  0x47   : > { %746 = vmatpush.bf16.msra.mxu3 %v2229_v29  ;;  %v1712_v29 = vld [vmem:[%s3638_s7 + $0x68] sm:$0xff] }
  0x54   : > { %2146 = vmatmul.msk.bf16.gmra.mxu0 %vm354_vm0, %v330_v26 }
  0x91   : > { %v388_v34 = vpop.f32.mrf.mxu0 }
  0x92   : > { %v389_v36 = vadd.f32 %v2725_v35, %v388_v34 }
  0x94   : > { %v428_v39 = vmax.f32 %v389_v36, 0.0 }
  0x99   : > { %v390_v37 = vpop.f32.mrf.mxu0  ;;  %v2733_v56 = vpop.f32.mrf.mxu3 }
  0x9a   : > { %v391_v38 = vadd.f32 %v2725_v35, %v390_v37  ;;  %v2208_v37 = vld [vmem:[%s3636_s5 + $0x30] sm:$0xf] }
  0x9c   : > { %v429_v40 = vmax.f32 %v391_v38, 0.0  ;;  %v2425_v38 = vld [vmem:[%s3636_s5 + $0x34] sm:$0xf0] }
  0x9e   : > { %v444_v41 = vpack.c.bf16 %v429_v40, %v428_v39 }
  0xa0   : > { %528 = vmatmul.bf16.vlgmr.msra.gmra.mxu1 %v444_v41  ;;  %v2221_v41 = vor.u32 %v2426_v32, %v2218_v33 }
  0xa1   : > { %v393_v42 = vpop.f32.mrf.mxu0  ;;  %v2736_v59 = vpop.f32.mrf.mxu3 }
  0xa2   : > { %v394_v43 = vadd.f32 %v2725_v35, %v393_v42  ;;  %v2209_v42 = vor.u32 %v2425_v38, %v2208_v37  ;;  %747 = vmatpush.bf16.msra.mxu3 %v2221_v41  ;;  %v1730_v38 = vld [vmem:[%s3638_s7 + $0xf8] sm:$0xff] }
  0xa3   : > { %v1710_v41 = vld [vmem:[%s3638_s7 + $0x58] sm:$0xff] }
  0xa4   : > { %v430_v46 = vmax.f32 %v394_v43, 0.0  ;;  %699 = vmatpush.bf16.msrb.mxu2 %v2209_v42  ;;  %v1729_v42 = vld [vmem:[%s3638_s7 + $0xf0] sm:$0xff] }
  0xa9   : > { %v395_v44 = vpop.f32.mrf.mxu0  ;;  %v418_v1 = vpop.f32.mrf.mxu3 }
  0xaa   : > { %v396_v45 = vadd.f32 %v2725_v35, %v395_v44  ;;  %v419_v16 = vadd.f32 %v2725_v35, %v418_v1  ;;  %v2200_v44 = vld [vmem:[%s3636_s5 + $0x20] sm:$0xf] }
  0xac   : > { %v431_v47 = vmax.f32 %v396_v45, 0.0  ;;  %v440_v26 = vmax.f32 %v419_v16, 0.0  ;;  %v2423_v45 = vld [vmem:[%s3636_s5 + $0x24] sm:$0xf0] }
  0xae   : > { %v445_v48 = vpack.c.bf16 %v431_v47, %v430_v46  ;;  %v2201_v46 = vor.u32 %v2423_v45, %v2200_v44  ;;  %v414_v47 = vadd.f32 %v2725_v35, %v2733_v56  ;;  %v2424_v56 = vld [vmem:[%s3636_s5 + $0x34] sm:$0xf] }
  0xb0   : > { %533 = vmatmul.bf16.gmra.mxu1 %v445_v48  ;;  %v416_v48 = vadd.f32 %v2725_v35, %v2736_v59  ;;  %700 = vmatpush.bf16.msrb.mxu2 %v2201_v46  ;;  %v2210_v59 = vld [vmem:[%s3636_s5 + $0x38] sm:$0xf0] }
  0xb1   : > { %v398_v49 = vpop.f32.mrf.mxu0  ;;  %v420_v22 = vpop.f32.mrf.mxu3 }
  0xb2   : > { %v399_v50 = vadd.f32 %v2725_v35, %v398_v49  ;;  %v421_v27 = vadd.f32 %v2725_v35, %v420_v22 }
  0xb4   : > { %v432_v53 = vmax.f32 %v399_v50, 0.0  ;;  %v441_v30 = vmax.f32 %v421_v27, 0.0  ;;  %v438_v50 = vmax.f32 %v414_v47, 0.0  ;;  %v2603_v27 = vmov 0  }
  0xb5   : > { %2462 = vset.pattern.permute.xlu1 %v2603_v27  ;;  %2463 = vset.pattern.permute.xlu2 %v2603_v27 }
  0xb6   : > { %v450_v39 = vpack.c.bf16 %v441_v30, %v440_v26  ;;  %v1714_v26 = vld [vmem:[%s3638_s7 + $0x78] sm:$0xff]  ;;  %2464 = vset.pattern.permute.xlu0 %v2603_v27  ;;  %1888 = vperm.xlu2 %2463, %v1730_v38  }
  0xb7   : > { %1808 = vperm.xlu1 %2462, %v1714_v26  }
  0xb8   : > { %558 = vmatmul.bf16.vlgmr.msrb.gmra.mxu3 %v450_v39 }
  0xb9   : > { %v400_v51 = vpop.f32.mrf.mxu0  ;;  %v423_v43 = vpop.f32.mrf.mxu3 }
  0xba   : > { %v401_v52 = vadd.f32 %v2725_v35, %v400_v51  ;;  %v424_v49 = vadd.f32 %v2725_v35, %v423_v43  ;;  %v439_v51 = vmax.f32 %v416_v48, 0.0  ;;  %v1726_v48 = vld [vmem:[%s3638_s7 + $0xd8] sm:$0xff] }
  0xbc   : > { %v433_v54 = vmax.f32 %v401_v52, 0.0 }
  0xbe   : > { %v446_v55 = vpack.c.bf16 %v433_v54, %v432_v53  ;;  %v442_v53 = vmax.f32 %v424_v49, 0.0  ;;  %1883 = vperm.xlu2 %2463, %v1729_v42   ;;  %v1725_v49 = vld [vmem:[%s3638_s7 + $0xd0] sm:$0xff] }
  0xbf   : > { %1798 = vperm.xlu1 %2462, %v1712_v29  }
  0xc0   : > { %538 = vmatmul.bf16.vlgmr.msra.gmra.mxu2 %v446_v55 }
  0xc1   : > { %v403_v57 = vpop.f32.mrf.mxu0  ;;  %v425_v52 = vpop.f32.mrf.mxu3 }
  0xc2   : > { %v404_v58 = vadd.f32 %v2725_v35, %v403_v57  ;;  %v426_v54 = vadd.f32 %v2725_v35, %v425_v52  ;;  %v449_v57 = vpack.c.bf16 %v439_v51, %v438_v50  ;;  %v1728_v51 = vld [vmem:[%s3638_s7 + $0xe8] sm:$0xff] }
  0xc4   : > { %v434_v62 = vmax.f32 %v404_v58, 0.0  ;;  %v443_v55 = vmax.f32 %v426_v54, 0.0  ;;  %v1727_v54 = vld [vmem:[%s3638_s7 + $0xe0] sm:$0xff] }
  0xc6   : > { %v451_v58 = vpack.c.bf16 %v443_v55, %v442_v53  ;;  %1878 = vperm.xlu2 %2463, %v1728_v51   ;;  %v1708_v53 = vld [vmem:[%s3638_s7 + $0x48] sm:$0xff] }
  0xc8   : > { %563 = vmatmul.bf16.gmra.mxu3 %v451_v58 }
  0xc9   : > { %v405_v60 = vpop.f32.mrf.mxu0 }
  0xca   : > { %v406_v61 = vadd.f32 %v2725_v35, %v405_v60  ;;  %v2213_v60 = vor.u32 %v2424_v56, %v2210_v59 }
  0xcc   : > { %v435_v63 = vmax.f32 %v406_v61, 0.0  ;;  %748 = vmatpush.bf16.msra.mxu3 %v2213_v60  ;;  %v2422_v61 = vld [vmem:[%s3636_s5 + $0x24] sm:$0xf] }
  0xce   : > { %v447_v0 = vpack.c.bf16 %v435_v63, %v434_v62  ;;  %v2192_v63 = vld [vmem:[%s3636_s5 + $0x10] sm:$0xf]  ;;  %1873 = vperm.xlu2 %2463, %v1727_v54  }
  0xd0   : > { %543 = vmatmul.bf16.gmra.mxu2 %v447_v0  ;;  %v2421_v0 = vld [vmem:[%s3636_s5 + $0x14] sm:$0xf0] }
  0xd1   : > { %v408_v5 = vpop.f32.mrf.mxu0  ;;  %v2193_v1 = vor.u32 %v2421_v0, %v2192_v63  ;;  %v1724_v0 = vld [vmem:[%s3638_s7 + $0xc8] sm:$0xff] }
  0xd2   : > { %v409_v21 = vadd.f32 %v2725_v35, %v408_v5  ;;  %v2184_v5 = vld [vmem:[%s3636_s5] sm:$0xf] }
  0xd3   : > { %701 = vmatpush.bf16.msrb.mxu2 %v2193_v1  ;;  %v2185_v8 = vor.u32 %v2419_v6, %v2184_v5 }
  0xd4   : > { %v436_v34 = vmax.f32 %v409_v21, 0.0 }
  0xd7   : > { %702 = vmatpush.bf16.msrb.mxu2 %v2185_v8 }
  0xd9   : > { %v410_v25 = vpop.f32.mrf.mxu0 }
  0xda   : > { %v411_v28 = vadd.f32 %v2725_v35, %v410_v25  ;;  %v2202_v35 = vld [vmem:[%s3636_s5 + $0x28] sm:$0xf0] }
  0xdb   : > { %v2205_v62 = vor.u32 %v2422_v61, %v2202_v35  ;;  %v1709_v61 = vld [vmem:[%s3638_s7 + $0x50] sm:$0xff] }
  0xdc   : > { %v437_v36 = vmax.f32 %v411_v28, 0.0  ;;  %1783 = vperm.xlu2 %2463, %v1709_v61  }
  0xdd   : > { %749 = vmatpush.bf16.msra.mxu3 %v2205_v62 }
  0xde   : > { %v448_v40 = vpack.c.bf16 %v437_v36, %v436_v34  ;;  %v1711_v36 = vld [vmem:[%s3638_s7 + $0x60] sm:$0xff] }
  0xdf   : > { %1793 = vperm.xlu1 %2462, %v1711_v36  }
  0xe0   : > { %548 = vmatmul.bf16.gmra.mxu2 %v448_v40  ;;  %v1713_v40 = vld [vmem:[%s3638_s7 + $0x70] sm:$0xff] }
  0xe1   : > { %750 = vmatpush.bf16.msra.mxu3 %v2197_v4  ;;  %1803 = vperm.xlu0 %2464, %v1713_v40  }
  0xe4   : > { %1858 = vperm.xlu2 %2463, %v1724_v0  }
  0xe5   : > { %751 = vmatpush.bf16.msra.mxu3 %v2189_v10 }
  0xe7   : > { %1788 = vperm.xlu1 %2462, %v1710_v41  }
  0xe9   : > { %1868 = vperm.xlu0 %2464, %v1726_v48  }
  0xef   : > { %1863 = vperm.xlu1 %2462, %v1725_v49  }
  0xf0   : > { %553 = vmatmul.bf16.gmra.mxu2 %v449_v57 }
  0xf1   : > { %1778 = vperm.xlu0 %2464, %v1708_v53  }
 0x110   : > { %v2941_v38 = vpop.permute.xlu2 %1888 }
 0x118   : > { %v2996_v61 = vpop.permute.xlu2 %1883 }
 0x11d   : > { %v529_v11 = vpop.f32.mrf.mxu1 }
 0x11e   : > { %v530_v13 = vadd.f32 %v2848_v12, %v529_v11 }
 0x120   : > { %v569_v16 = vmax.f32 %v530_v13, 0.0 }
 0x125   : > { %v531_v14 = vpop.f32.mrf.mxu1 }
 0x126   : > { %v532_v15 = vadd.f32 %v2848_v12, %v531_v14 }
 0x128   : > { %v570_v17 = vmax.f32 %v532_v15, 0.0 }
 0x12a   : > { %v585_v18 = vpack.c.bf16 %v570_v17, %v569_v16 }
 0x12c   : > { %703 = vmatmul.bf16.vlgmr.msrb.gmra.mxu2 %v585_v18  ;;  %752 = vmatmul.bf16.vlgmr.msra.gmra.mxu3 %v585_v18 }
 0x12d   : > { %v534_v19 = vpop.f32.mrf.mxu1 }
 0x12e   : > { %v535_v20 = vadd.f32 %v2848_v12, %v534_v19 }
 0x130   : > { %v571_v23 = vmax.f32 %v535_v20, 0.0  ;;  %v937_v20 = vlaneseq }
 0x135   : > { %v536_v21 = vpop.f32.mrf.mxu1 }
 0x136   : > { %v537_v22 = vadd.f32 %v2848_v12, %v536_v21  ;;  %v2908_v21 = vshrl.u32 %v937_v20, 7 }
 0x138   : > { %v572_v24 = vmax.f32 %v537_v22, 0.0  ;;  %v609_v22 = vld [vmem:[%s3637_s6] sm:$0x3]  ;;  %v967_v36 = vadd.s32 232, %v2908_v21  ;;  %v951_v41 = vadd.s32 104, %v2908_v21  ;;  %v965_v48 = vadd.s32 216, %v2908_v21 }
 0x139   : > { %v2925_v29 = vperm.slane %v609_v22, 0  ;;  %v948_v53 = vadd.s32 80, %v2908_v21 }
 0x13a   : > { %v586_v25 = vpack.c.bf16 %v572_v24, %v571_v23  ;;  %v968_v23 = vadd.s32 240, %v2908_v21  ;;  %v969_v24 = vadd.s32 248, %v2908_v21  ;;  %v2951_v42 = vshra.s32 %v967_v36, 6 }
 0x13b   : > { %v559_v62 = vpop.f32.mrf.mxu3 }
 0x13c   : > { %708 = vmatmul.bf16.gmra.mxu2 %v586_v25  ;;  %757 = vmatmul.bf16.gmra.mxu3 %v586_v25  ;;  %v560_v7 = vadd.f32 %v2848_v12, %v559_v62  ;;  %v2915_v25 = vand.u32 127, %v937_v20  ;;  %v2917_v26 = vshra.s32 %v968_v23, 6  ;;  %v946_v62 = vadd.s32 64, %v2908_v21  ;;  %v3052_v20 = vpop.permute.xlu2 %1878 }
 0x13e   : > { %v581_v10 = vmax.f32 %v560_v7, 0.0  ;;  %v2922_v27 = vshra.s32 %v2915_v25, 6 }
 0x140   : > { %vm1067_vm1 = vcmp.eq.s32.totalorder %v2917_v26, %v2922_v27  ;;  %vm1065_vm8 = vcmp.eq.s32.totalorder %v2951_v42, %v2922_v27 }
 0x143   : > { %v539_v28 = vpop.f32.mrf.mxu2  ;;  %v561_v5 = vpop.f32.mrf.mxu3 }
 0x144   : > { %v540_v30 = vadd.f32 %v2848_v12, %v539_v28  ;;  %v562_v8 = vadd.f32 %v2848_v12, %v561_v5  ;;  %v952_v28 = vadd.s32 112, %v2908_v21  ;;  %v960_v5 = vadd.s32 176, %v2908_v21 }
 0x146   : > { %v573_v33 = vmax.f32 %v540_v30, 0.0  ;;  %v582_v11 = vmax.f32 %v562_v8, 0.0  ;;  %v2927_v30 = vperm.slane %v609_v22, 1  ;;  %v961_v8 = vadd.s32 184, %v2908_v21 }
 0x148   : > { %v591_v13 = vpack.c.bf16 %v582_v11, %v581_v10  ;;  %v944_v10 = vadd.s32 48, %v2908_v21 }
 0x14b   : > { %v541_v31 = vpop.f32.mrf.mxu2  ;;  %v564_v9 = vpop.f32.mrf.mxu3 }
 0x14c   : > { %v542_v32 = vadd.f32 %v2848_v12, %v541_v31  ;;  %v565_v15 = vadd.f32 %v2848_v12, %v564_v9  ;;  %v953_v31 = vadd.s32 120, %v2908_v21  ;;  %v3030_v9 = vshra.s32 %v960_v5, 6  ;;  %v1874_v5 = vpop.permute.xlu2 %1873 }
 0x14e   : > { %v574_v34 = vmax.f32 %v542_v32, 0.0  ;;  %v583_v17 = vmax.f32 %v565_v15, 0.0  ;;  %v2934_v32 = vshra.s32 %v952_v28, 6  ;;  %v945_v15 = vadd.s32 56, %v2908_v21 }
 0x14f   : > { %v943_v28 = vadd.s32 40, %v2908_v21 }
 0x150   : > { %v587_v37 = vpack.c.bf16 %v574_v34, %v573_v33  ;;  %v966_v33 = vadd.s32 224, %v2908_v21  ;;  %v2937_v34 = vshra.s32 %v953_v31, 6  ;;  %vm1035_vm4 = vcmp.eq.s32.totalorder %v2934_v32, %v2922_v27 }
 0x152   : > { %713 = vmatmul.bf16.gmra.mxu2 %v587_v37  ;;  %762 = vmatmul.bf16.gmra.mxu3 %v587_v37  ;;  %v950_v37 = vadd.s32 96, %v2908_v21  ;;  %v2946_v40 = vshra.s32 %v966_v33, 6  ;;  %vm1037_vm5 = vcmp.eq.s32.totalorder %v2937_v34, %v2922_v27 }
 0x153   : > { %v544_v39 = vpop.f32.mrf.mxu2  ;;  %v566_v14 = vpop.f32.mrf.mxu3  ;;  %vm2310_vm6 = vmpackc.low %vm1037_vm5, %vm1035_vm4 }
 0x154   : > { %v545_v43 = vadd.f32 %v2848_v12, %v544_v39  ;;  %v567_v16 = vadd.f32 %v2848_v12, %v566_v14  ;;  %v2604_v39 = vmov 1.0|1.0   ;;  %vm1063_vm7 = vcmp.eq.s32.totalorder %v2946_v40, %v2922_v27 }
 0x155   : > { %2311 = vmatpush.bf16.msk.msrb.mxu0 %vm2310_vm6, %v2604_v39  ;;  %vm2328_vm10 = vmpackc.low %vm1065_vm8, %vm1063_vm7  ;;  %v3038_v14 = vshra.s32 %v961_v8, 6 }
 0x156   : > { %v575_v46 = vmax.f32 %v545_v43, 0.0  ;;  %v584_v18 = vmax.f32 %v567_v16, 0.0  ;;  %v2953_v43 = vshra.s32 %v950_v37, 6  ;;  %v3043_v16 = vshra.s32 %v944_v10, 6 }
 0x157   : > { %v956_v37 = vadd.s32 144, %v2908_v21  ;;  %v939_v10 = vadd.s32 8, %v2908_v21 }
 0x158   : > { %v592_v19 = vpack.c.bf16 %v584_v18, %v583_v17  ;;  %vm1031_vm9 = vcmp.eq.s32.totalorder %v2953_v43, %v2922_v27  ;;  %v958_v17 = vadd.s32 160, %v2908_v21  ;;  %v959_v18 = vadd.s32 168, %v2908_v21 }
 0x15a   : > { %v3056_v22 = vshra.s32 %v958_v17, 6  ;;  %v3058_v23 = vshra.s32 %v959_v18, 6  ;;  %v3119_v18 = vshra.s32 %v2908_v21, 6 }
 0x15b   : > { %v546_v44 = vpop.f32.mrf.mxu2 }
 0x15c   : > { %v547_v45 = vadd.f32 %v2848_v12, %v546_v44 }
 0x15e   : > { %v576_v47 = vmax.f32 %v547_v45, 0.0 }
 0x160   : > { %v588_v50 = vpack.c.bf16 %v576_v47, %v575_v46  ;;  %v2957_v46 = vshra.s32 %v951_v41, 6  ;;  %v964_v47 = vadd.s32 208, %v2908_v21 }
 0x162   : > { %718 = vmatmul.bf16.gmra.mxu2 %v588_v50  ;;  %767 = vmatmul.bf16.gmra.mxu3 %v588_v50  ;;  %vm1033_vm11 = vcmp.eq.s32.totalorder %v2957_v46, %v2922_v27  ;;  %v2974_v51 = vshra.s32 %v964_v47, 6  ;;  %v957_v47 = vadd.s32 152, %v2908_v21 }
 0x163   : > { %v549_v52 = vpop.f32.mrf.mxu2  ;;  %vm2312_vm12 = vmpackc.low %vm1033_vm11, %vm1031_vm9  ;;  %vm1051_vm9 = vcmp.eq.s32.totalorder %v3030_v9, %v2922_v27 }
 0x164   : > { %v550_v55 = vadd.f32 %v2848_v12, %v549_v52  ;;  %v2976_v52 = vshra.s32 %v965_v48, 6  ;;  %vm1059_vm13 = vcmp.eq.s32.totalorder %v2974_v51, %v2922_v27  ;;  %2313 = vmatpush.bf16.msk.msrb.mxu0 %vm2312_vm12, %v2604_v39  ;;  %vm1019_vm12 = vcmp.eq.s32.totalorder %v3043_v16, %v2922_v27 }
 0x165   : > { %v3084_v48 = vshra.s32 %v956_v37, 6 }
 0x166   : > { %v577_v56 = vmax.f32 %v550_v55, 0.0  ;;  %v2982_v55 = vpop.permute.xlu1 %1808  ;;  %vm1061_vm14 = vcmp.eq.s32.totalorder %v2976_v52, %v2922_v27 }
 0x167   : > { %vm2330_vm15 = vmpackc.low %vm1061_vm14, %vm1059_vm13 }
 0x16b   : > { %v551_v57 = vpop.f32.mrf.mxu2 }
 0x16c   : > { %v552_v58 = vadd.f32 %v2848_v12, %v551_v57  ;;  %v949_v57 = vadd.s32 88, %v2908_v21 }
 0x16e   : > { %v578_v59 = vmax.f32 %v552_v58, 0.0  ;;  %v2989_v58 = vshra.s32 %v948_v53, 6  ;;  %v940_v53 = vadd.s32 16, %v2908_v21 }
 0x170   : > { %v589_v60 = vpack.c.bf16 %v578_v59, %v577_v56  ;;  %v962_v56 = vadd.s32 192, %v2908_v21  ;;  %v2993_v59 = vshra.s32 %v949_v57, 6  ;;  %vm1027_vm0 = vcmp.eq.s32.totalorder %v2989_v58, %v2922_v27 }
 0x172   : > { %723 = vmatmul.bf16.gmra.mxu2 %v589_v60  ;;  %772 = vmatmul.bf16.gmra.mxu3 %v589_v60  ;;  %v963_v60 = vadd.s32 200, %v2908_v21 }
 0x173   : > { %v554_v35 = vpop.f32.mrf.mxu2 }
 0x174   : > { %v555_v63 = vadd.f32 %v2848_v12, %v554_v35  ;;  %v3000_v35 = vshra.s32 %v962_v56, 6  ;;  %v3007_v0 = vshra.s32 %v963_v60, 6  ;;  %v3093_v60 = vshra.s32 %v957_v47, 6 }
 0x176   : > { %v579_v2 = vmax.f32 %v555_v63, 0.0  ;;  %v947_v63 = vadd.s32 72, %v2908_v21  ;;  %vm1057_vm4 = vcmp.eq.s32.totalorder %v3007_v0, %v2922_v27 }
 0x17b   : > { %v556_v1 = vpop.f32.mrf.mxu2 }
 0x17c   : > { %v557_v3 = vadd.f32 %v2848_v12, %v556_v1  ;;  %v2919_v12 = vshra.s32 %v969_v24, 6  ;;  %v942_v24 = vadd.s32 32, %v2908_v21 }
 0x17e   : > { %v580_v4 = vmax.f32 %v557_v3, 0.0  ;;  %vm1069_vm2 = vcmp.eq.s32.totalorder %v2919_v12, %v2922_v27  ;;  %v3011_v3 = vshra.s32 %v946_v62, 6  ;;  %v3069_v36 = vshra.s32 %v942_v24, 6 }
 0x17f   : > { %vm2326_vm3 = vmpackc.low %vm1069_vm2, %vm1067_vm1  ;;  %vm1029_vm1 = vcmp.eq.s32.totalorder %v2993_v59, %v2922_v27  ;;  %v3097_v62 = vshra.s32 %v940_v53, 6  ;;  %v3121_v24 = vshra.s32 %v939_v10, 6 }
 0x180   : > { %v590_v6 = vpack.c.bf16 %v580_v4, %v579_v2  ;;  %2327 = vmatpush.bf16.msk.msrb.mxu1 %vm2326_vm3, %v2604_v39  ;;  %vm2314_vm2 = vmpackc.low %vm1029_vm1, %vm1027_vm0  ;;  %vm1055_vm3 = vcmp.eq.s32.totalorder %v3000_v35, %v2922_v27  ;;  %v3013_v4 = vshra.s32 %v947_v63, 6  ;;  %vm1023_vm6 = vcmp.eq.s32.totalorder %v3011_v3, %v2922_v27 }
 0x181   : > { %2315 = vmatpush.bf16.msk.msrb.mxu0 %vm2314_vm2, %v2604_v39  ;;  %vm2332_vm5 = vmpackc.low %vm1057_vm4, %vm1055_vm3  ;;  %vm1049_vm0 = vcmp.eq.s32.totalorder %v3058_v23, %v2922_v27  ;;  %vm1015_vm2 = vcmp.eq.s32.totalorder %v3069_v36, %v2922_v27 }
 0x182   : > { %728 = vmatmul.bf16.gmra.mxu2 %v590_v6  ;;  %777 = vmatmul.bf16.gmra.mxu3 %v590_v6  ;;  %vm1025_vm7 = vcmp.eq.s32.totalorder %v3013_v4, %v2922_v27 }
 0x183   : > { %vm2316_vm8 = vmpackc.low %vm1025_vm7, %vm1023_vm6  ;;  %vm1045_vm6 = vcmp.eq.s32.totalorder %v3093_v60, %v2922_v27 }
 0x184   : > { %2329 = vmatpush.bf16.msk.msrb.mxu1 %vm2328_vm10, %v2604_v39  ;;  %vm1053_vm10 = vcmp.eq.s32.totalorder %v3038_v14, %v2922_v27 }
 0x185   : > { %2317 = vmatpush.bf16.msk.msrb.mxu0 %vm2316_vm8, %v2604_v39  ;;  %vm2334_vm11 = vmpackc.low %vm1053_vm10, %vm1051_vm9  ;;  %vm1011_vm8 = vcmp.eq.s32.totalorder %v3097_v62, %v2922_v27 }
 0x188   : > { %2331 = vmatpush.bf16.msk.msrb.mxu1 %vm2330_vm15, %v2604_v39  ;;  %vm1047_vm15 = vcmp.eq.s32.totalorder %v3056_v22, %v2922_v27 }
 0x189   : > { %vm2336_vm1 = vmpackc.low %vm1049_vm0, %vm1047_vm15  ;;  %vm1007_vm15 = vcmp.eq.s32.totalorder %v3119_v18, %v2922_v27  ;;  %vm1009_vm0 = vcmp.eq.s32.totalorder %v3121_v24, %v2922_v27 }
 0x18c   : > { %2333 = vmatpush.bf16.msk.msrb.mxu1 %vm2332_vm5, %v2604_v39  ;;  %vm1043_vm5 = vcmp.eq.s32.totalorder %v3084_v48, %v2922_v27 }
 0x18d   : > { %vm2338_vm7 = vmpackc.low %vm1045_vm6, %vm1043_vm5  ;;  %vm1696_vm5 = vcmp.eq.s32.totalorder %v2951_v42, %v2915_v25  ;;  %vm1680_vm6 = vcmp.eq.s32.totalorder %v2957_v46, %v2915_v25 }
 0x190   : > { %2335 = vmatpush.bf16.msk.msrb.mxu1 %vm2334_vm11, %v2604_v39 }
 0x192   : > { %733 = vmatmul.bf16.gmra.mxu2 %v591_v13  ;;  %782 = vmatmul.bf16.gmra.mxu3 %v591_v13  ;;  %v3036_v13 = vpop.permute.xlu1 %1798 }
 0x194   : > { %2337 = vmatpush.bf16.msk.msrb.mxu1 %vm2336_vm1, %v2604_v39  ;;  %vm2324_vm1 = vmpackc.low %vm1009_vm0, %vm1007_vm15 }
 0x198   : > { %2339 = vmatpush.bf16.msk.msrb.mxu1 %vm2338_vm7, %v2604_v39  ;;  %vm1695_vm7 = vcmp.eq.s32.totalorder %v2946_v40, %v2915_v25 }
 0x19a   : > { %v1794_v56 = vpop.permute.xlu1 %1793 }
 0x1a2   : > { %738 = vmatmul.bf16.gmra.mxu2 %v592_v19  ;;  %787 = vmatmul.bf16.gmra.mxu3 %v592_v19  ;;  %v3050_v19 = vshra.s32 %v945_v15, 6  ;;  %v1789_v37 = vpop.permute.xlu1 %1788 }
 0x1a4   : > { %vm1021_vm13 = vcmp.eq.s32.totalorder %v3050_v19, %v2922_v27 }
 0x1a5   : > { %vm2318_vm14 = vmpackc.low %vm1021_vm13, %vm1019_vm12  ;;  %vm1698_vm13 = vcmp.eq.s32.totalorder %v2919_v12, %v2915_v25 }
 0x1a6   : > { %2319 = vmatpush.bf16.msk.msrb.mxu0 %vm2318_vm14, %v2604_v39 }
 0x1af   : > { %v704_v44 = vpop.f32.mrf.mxu2  ;;  %v753_v45 = vpop.f32.mrf.mxu3 }
 0x1b0   : > { %v2962_v49 = vadd.f32 %v704_v44, %v2925_v29  ;;  %v2965_v50 = vadd.f32 %v753_v45, %v2927_v30  ;;  %v3079_v45 = vshra.s32 %v943_v28, 6 }
 0x1b2   : > { %v793_v54 = vmax.f32 %v2962_v49, %v2965_v50  ;;  %vm1017_vm3 = vcmp.eq.s32.totalorder %v3079_v45, %v2922_v27 }
 0x1b3   : > { %vm2320_vm4 = vmpackc.low %vm1017_vm3, %vm1015_vm2  ;;  %vm1682_vm2 = vcmp.eq.s32.totalorder %v2937_v34, %v2915_v25  ;;  %vm1697_vm3 = vcmp.eq.s32.totalorder %v2917_v26, %v2915_v25 }
 0x1b4   : > { %794 = vmax.xlane.f32.xlu0 %v793_v54  ;;  %v941_v54 = vadd.s32 24, %v2908_v21  ;;  %2321 = vmatpush.bf16.msk.msrb.mxu0 %vm2320_vm4, %v2604_v39  ;;  %vm1681_vm4 = vcmp.eq.s32.totalorder %v2934_v32, %v2915_v25 }
 0x1b6   : > { %v3099_v63 = vshra.s32 %v941_v54, 6 }
 0x1b7   : > { %v706_v1 = vpop.f32.mrf.mxu2  ;;  %v755_v2 = vpop.f32.mrf.mxu3 }
 0x1b8   : > { %v3017_v6 = vadd.f32 %v706_v1, %v2925_v29  ;;  %v3020_v7 = vadd.f32 %v755_v2, %v2927_v30  ;;  %v954_v1 = vadd.s32 128, %v2908_v21  ;;  %v955_v2 = vadd.s32 136, %v2908_v21 }
 0x1b9   : > { %vm1013_vm9 = vcmp.eq.s32.totalorder %v3099_v63, %v2922_v27 }
 0x1ba   : > { %v796_v11 = vmax.f32 %v3017_v6, %v3020_v7  ;;  %v3110_v8 = vshra.s32 %v954_v1, 6  ;;  %vm2322_vm10 = vmpackc.low %vm1013_vm9, %vm1011_vm8  ;;  %vm1679_vm8 = vcmp.eq.s32.totalorder %v2953_v43, %v2915_v25  ;;  %vm1694_vm9 = vcmp.eq.s32.totalorder %v2976_v52, %v2915_v25 }
 0x1bb   : > { %2323 = vmatpush.bf16.msk.msrb.mxu0 %vm2322_vm10, %v2604_v39  ;;  %vm1678_vm10 = vcmp.eq.s32.totalorder %v2993_v59, %v2915_v25 }
 0x1bc   : > { %797 = vmax.xlane.f32.xlu0 %v796_v11  ;;  %v3114_v11 = vshra.s32 %v955_v2, 6  ;;  %vm1039_vm11 = vcmp.eq.s32.totalorder %v3110_v8, %v2922_v27 }
 0x1be   : > { %vm1041_vm12 = vcmp.eq.s32.totalorder %v3114_v11, %v2922_v27  ;;  %v1784_v27 = vpop.permute.xlu2 %1783 }
 0x1bf   : > { %v709_v31 = vpop.f32.mrf.mxu2  ;;  %v758_v33 = vpop.f32.mrf.mxu3  ;;  %vm2340_vm14 = vmpackc.low %vm1041_vm12, %vm1039_vm11  ;;  %2325 = vmatpush.bf16.msk.msrb.mxu0 %vm2324_vm1, %v2604_v39  ;;  %vm1693_vm11 = vcmp.eq.s32.totalorder %v2974_v51, %v2915_v25  ;;  %vm1677_vm12 = vcmp.eq.s32.totalorder %v2989_v58, %v2915_v25 }
 0x1c0   : > { %v3073_v41 = vadd.f32 %v709_v31, %v2925_v29  ;;  %v3076_v44 = vadd.f32 %v758_v33, %v2927_v30  ;;  %v1804_v33 = vpop.permute.xlu0 %1803  ;;  %2341 = vmatpush.bf16.msk.msrb.mxu1 %vm2340_vm14, %v2604_v39 }
 0x1c2   : > { %v799_v57 = vmax.f32 %v3073_v41, %v3076_v44 }
 0x1c3   : > { %2374 = vmatpush.msk.msra.mxu0 %vm1682_vm2, %v2982_v55  ;;  %v1864_v55 = vpop.permute.xlu1 %1863 }
 0x1c4   : > { %800 = vmax.xlane.f32.xlu1 %v799_v57  ;;  %2390 = vmatpush.msk.msra.mxu1 %vm1698_vm13, %v2941_v38  ;;  %vm1692_vm13 = vcmp.eq.s32.totalorder %v3007_v0, %v2915_v25 }
 0x1c5   : > { %2375 = vmatpush.msk.msra.mxu0 %vm1681_vm4, %v1804_v33 }
 0x1c6   : > { %2391 = vmatpush.msk.msra.mxu1 %vm1697_vm3, %v2996_v61  ;;  %v1859_v53 = vpop.permute.xlu2 %1858 }
 0x1c7   : > { %v711_v15 = vpop.f32.mrf.mxu2  ;;  %v760_v17 = vpop.f32.mrf.mxu3  ;;  %2376 = vmatpush.msk.msra.mxu0 %vm1680_vm6, %v3036_v13 }
 0x1c8   : > { %v3124_v28 = vadd.f32 %v711_v15, %v2925_v29  ;;  %v3127_v31 = vadd.f32 %v760_v17, %v2927_v30  ;;  %2392 = vmatpush.msk.msra.mxu1 %vm1696_vm5, %v3052_v20  ;;  %v1869_v38 = vpop.permute.xlu0 %1868 }
 0x1c9   : > { %2377 = vmatpush.msk.msra.mxu0 %vm1679_vm8, %v1794_v56 }
 0x1ca   : > { %v802_v21 = vmax.f32 %v3124_v28, %v3127_v31  ;;  %2393 = vmatpush.msk.msra.mxu1 %vm1695_vm7, %v1874_v5 }
 0x1cb   : > { %2378 = vmatpush.msk.msra.mxu0 %vm1678_vm10, %v1789_v37 }
 0x1cc   : > { %803 = vmax.xlane.f32.xlu1 %v802_v21  ;;  %2394 = vmatpush.msk.msra.mxu1 %vm1694_vm9, %v1869_v38  ;;  %vm1676_vm9 = vcmp.eq.s32.totalorder %v3013_v4, %v2915_v25 }
 0x1cd   : > { %2379 = vmatpush.msk.msra.mxu0 %vm1677_vm12, %v1784_v27 }
 0x1ce   : > { %2395 = vmatpush.msk.msra.mxu1 %vm1693_vm11, %v1864_v55 }
 0x1d0   : > { %2396 = vmatpush.msk.msra.mxu1 %vm1692_vm13, %v1859_v53 }
 0x1d5   : > { %v714_v61 = vpop.f32.mrf.mxu2  ;;  %v763_v20 = vpop.f32.mrf.mxu3 }
 0x1d6   : > { %v3172_v13 = vadd.f32 %v714_v61, %v2925_v29  ;;  %v3175_v47 = vadd.f32 %v763_v20, %v2927_v30 }
 0x1d8   : > { %v805_v54 = vmax.f32 %v3172_v13, %v3175_v47 }
 0x1da   : > { %806 = vmax.xlane.f32.xlu2 %v805_v54 }
 0x1dd   : > { %v716_v57 = vpop.f32.mrf.mxu2  ;;  %v765_v56 = vpop.f32.mrf.mxu3 }
 0x1de   : > { %v3180_v1 = vadd.f32 %v716_v57, %v2925_v29  ;;  %v3183_v2 = vadd.f32 %v765_v56, %v2927_v30  ;;  %v1004_v56 = vadd.s32 128, %v2915_v25 }
 0x1e0   : > { %v808_v5 = vmax.f32 %v3180_v1, %v3183_v2 }
 0x1e2   : > { %809 = vmax.xlane.f32.xlu2 %v808_v5 }
 0x1e5   : > { %v719_v10 = vpop.f32.mrf.mxu2  ;;  %v768_v15 = vpop.f32.mrf.mxu3 }
 0x1e6   : > { %v3188_v17 = vadd.f32 %v719_v10, %v2925_v29  ;;  %v3191_v33 = vadd.f32 %v768_v15, %v2927_v30  ;;  %v3212_v10 = vshra.s32 %v1004_v56, 6 }
 0x1e8   : > { %v811_v21 = vmax.f32 %v3188_v17, %v3191_v33  ;;  %vm1036_vm14 = vcmp.eq.s32.totalorder %v2934_v32, %v3212_v10  ;;  %vm1038_vm15 = vcmp.eq.s32.totalorder %v2937_v34, %v3212_v10  ;;  %vm1068_vm0 = vcmp.eq.s32.totalorder %v2917_v26, %v3212_v10  ;;  %v1779_v26 = vpop.permute.xlu0 %1778 }
 0x1e9   : > { %vm1070_vm1 = vcmp.eq.s32.totalorder %v2919_v12, %v3212_v10  ;;  %vm2342_vm2 = vmpackc.low %vm1038_vm15, %vm1036_vm14  ;;  %vm1032_vm4 = vcmp.eq.s32.totalorder %v2953_v43, %v3212_v10  ;;  %vm1034_vm5 = vcmp.eq.s32.totalorder %v2957_v46, %v3212_v10  ;;  %vm1064_vm7 = vcmp.eq.s32.totalorder %v2946_v40, %v3212_v10  ;;  %2380 = vmatpush.msk.msra.mxu0 %vm1676_vm9, %v1779_v26 }
 0x1ea   : > { %812 = vmax.xlane.f32.xlu0 %v811_v21  ;;  %2343 = vmatpush.bf16.msk.msra.mxu2 %vm2342_vm2, %v2604_v39  ;;  %vm2358_vm3 = vmpackc.low %vm1070_vm1, %vm1068_vm0  ;;  %vm1066_vm8 = vcmp.eq.s32.totalorder %v2951_v42, %v3212_v10  ;;  %vm1028_vm11 = vcmp.eq.s32.totalorder %v2989_v58, %v3212_v10  ;;  %vm1030_vm12 = vcmp.eq.s32.totalorder %v2993_v59, %v3212_v10  ;;  %v1707_v58 = vld [vmem:[%s3638_s7 + $0x40] sm:$0xff] }
 0x1eb   : > { %2359 = vmatpush.bf16.msk.msrb.mxu3 %vm2358_vm3, %v2604_v39  ;;  %vm2344_vm6 = vmpackc.low %vm1034_vm5, %vm1032_vm4  ;;  %vm1060_vm13 = vcmp.eq.s32.totalorder %v2974_v51, %v3212_v10  ;;  %vm1062_vm14 = vcmp.eq.s32.totalorder %v2976_v52, %v3212_v10  ;;  %vm1024_vm1 = vcmp.eq.s32.totalorder %v3011_v3, %v3212_v10  ;;  %vm1026_vm2 = vcmp.eq.s32.totalorder %v3013_v4, %v3212_v10  ;;  %v1706_v51 = vld [vmem:[%s3638_s7 + $0x38] sm:$0xff]  ;;  %v1723_v52 = vld [vmem:[%s3638_s7 + $0xc0] sm:$0xff] }
 0x1ec   : > { %vm2360_vm10 = vmpackc.low %vm1066_vm8, %vm1064_vm7  ;;  %vm1056_vm3 = vcmp.eq.s32.totalorder %v3000_v35, %v3212_v10  ;;  %vm1058_vm4 = vcmp.eq.s32.totalorder %v3007_v0, %v3212_v10  ;;  %vm1020_vm7 = vcmp.eq.s32.totalorder %v3043_v16, %v3212_v10  ;;  %vm1022_vm8 = vcmp.eq.s32.totalorder %v3050_v19, %v3212_v10 }
 0x1ed   : > { %v721_v37 = vpop.f32.mrf.mxu2  ;;  %v770_v27 = vpop.f32.mrf.mxu3  ;;  %vm2346_vm15 = vmpackc.low %vm1030_vm12, %vm1028_vm11  ;;  %vm1052_vm9 = vcmp.eq.s32.totalorder %v3030_v9, %v3212_v10 }
 0x1ee   : > { %v3196_v38 = vadd.f32 %v721_v37, %v2925_v29  ;;  %v3199_v55 = vadd.f32 %v770_v27, %v2927_v30  ;;  %2345 = vmatpush.bf16.msk.msra.mxu2 %vm2344_vm6, %v2604_v39  ;;  %vm2362_vm0 = vmpackc.low %vm1062_vm14, %vm1060_vm13  ;;  %vm1016_vm13 = vcmp.eq.s32.totalorder %v3069_v36, %v3212_v10  ;;  %vm1018_vm14 = vcmp.eq.s32.totalorder %v3079_v45, %v3212_v10 }
 0x1ef   : > { %2361 = vmatpush.bf16.msk.msrb.mxu3 %vm2360_vm10, %v2604_v39  ;;  %vm2348_vm5 = vmpackc.low %vm1026_vm2, %vm1024_vm1  ;;  %vm1054_vm10 = vcmp.eq.s32.totalorder %v3038_v14, %v3212_v10 }
 0x1f0   : > { %v814_v61 = vmax.f32 %v3196_v38, %v3199_v55  ;;  %vm2364_vm6 = vmpackc.low %vm1058_vm4, %vm1056_vm3  ;;  %vm1012_vm3 = vcmp.eq.s32.totalorder %v3097_v62, %v3212_v10  ;;  %vm1014_vm4 = vcmp.eq.s32.totalorder %v3099_v63, %v3212_v10 }
 0x1f1   : > { %vm2350_vm11 = vmpackc.low %vm1022_vm8, %vm1020_vm7 }
 0x1f2   : > { %815 = vmax.xlane.f32.xlu1 %v814_v61  ;;  %2347 = vmatpush.bf16.msk.msra.mxu2 %vm2346_vm15, %v2604_v39  ;;  %vm2366_vm12 = vmpackc.low %vm1054_vm10, %vm1052_vm9  ;;  %vm1048_vm15 = vcmp.eq.s32.totalorder %v3056_v22, %v3212_v10  ;;  %vm1008_vm9 = vcmp.eq.s32.totalorder %v3119_v18, %v3212_v10  ;;  %vm1010_vm10 = vcmp.eq.s32.totalorder %v3121_v24, %v3212_v10 }
 0x1f3   : > { %2363 = vmatpush.bf16.msk.msrb.mxu3 %vm2362_vm0, %v2604_v39  ;;  %vm1050_vm0 = vcmp.eq.s32.totalorder %v3058_v23, %v3212_v10  ;;  %vm2352_vm1 = vmpackc.low %vm1018_vm14, %vm1016_vm13 }
 0x1f4   : > { %vm2368_vm2 = vmpackc.low %vm1050_vm0, %vm1048_vm15  ;;  %vm1691_vm15 = vcmp.eq.s32.totalorder %v3000_v35, %v2915_v25  ;;  %vm1675_vm0 = vcmp.eq.s32.totalorder %v3011_v3, %v2915_v25  ;;  %v1718_v35 = vld [vmem:[%s3638_s7 + $0x98] sm:$0xff]  ;;  %v1717_v3 = vld [vmem:[%s3638_s7 + $0x90] sm:$0xff] }
 0x1f5   : > { %v724_v20 = vpop.f32.mrf.mxu2  ;;  %v773_v53 = vpop.f32.mrf.mxu3  ;;  %vm2354_vm7 = vmpackc.low %vm1014_vm4, %vm1012_vm3  ;;  %vm1690_vm3 = vcmp.eq.s32.totalorder %v3038_v14, %v2915_v25  ;;  %vm1689_vm4 = vcmp.eq.s32.totalorder %v3030_v9, %v2915_v25 }
 0x1f6   : > { %v3204_v54 = vadd.f32 %v724_v20, %v2925_v29  ;;  %v3207_v57 = vadd.f32 %v773_v53, %v2927_v30  ;;  %2349 = vmatpush.bf16.msk.msra.mxu2 %vm2348_vm5, %v2604_v39  ;;  %vm1044_vm5 = vcmp.eq.s32.totalorder %v3084_v48, %v3212_v10  ;;  %vm2356_vm13 = vmpackc.low %vm1010_vm10, %vm1008_vm9  ;;  %vm1686_vm9 = vcmp.eq.s32.totalorder %v3093_v60, %v2915_v25 }
 0x1f7   : > { %2365 = vmatpush.bf16.msk.msrb.mxu3 %vm2364_vm6, %v2604_v39  ;;  %vm1046_vm6 = vcmp.eq.s32.totalorder %v3093_v60, %v3212_v10  ;;  %vm1670_vm10 = vcmp.eq.s32.totalorder %v3099_v63, %v2915_v25 }
 0x1f8   : > { %v817_v5 = vmax.f32 %v3204_v54, %v3207_v57  ;;  %vm2370_vm8 = vmpackc.low %vm1046_vm6, %vm1044_vm5  ;;  %vm1688_vm5 = vcmp.eq.s32.totalorder %v3058_v23, %v2915_v25  ;;  %vm1672_vm6 = vcmp.eq.s32.totalorder %v3079_v45, %v2915_v25 }
 0x1fa   : > { %818 = vmax.xlane.f32.xlu2 %v817_v5  ;;  %2351 = vmatpush.bf16.msk.msra.mxu2 %vm2350_vm11, %v2604_v39  ;;  %vm1040_vm11 = vcmp.eq.s32.totalorder %v3110_v8, %v3212_v10 }
 0x1fb   : > { %2367 = vmatpush.bf16.msk.msrb.mxu3 %vm2366_vm12, %v2604_v39  ;;  %vm1042_vm12 = vcmp.eq.s32.totalorder %v3114_v11, %v3212_v10 }
 0x1fc   : > { %vm2372_vm14 = vmpackc.low %vm1042_vm12, %vm1040_vm11  ;;  %vm1669_vm11 = vcmp.eq.s32.totalorder %v3097_v62, %v2915_v25  ;;  %vm1668_vm12 = vcmp.eq.s32.totalorder %v3121_v24, %v2915_v25 }
 0x1fd   : > { %v726_v15 = vpop.f32.mrf.mxu2  ;;  %v775_v21 = vpop.f32.mrf.mxu3 }
 0x1fe   : > { %v3225_v37 = vadd.f32 %v726_v15, %v2925_v29  ;;  %v3228_v32 = vadd.f32 %v775_v21, %v2927_v30  ;;  %2353 = vmatpush.bf16.msk.msra.mxu2 %vm2352_vm1, %v2604_v39  ;;  %vm1674_vm1 = vcmp.eq.s32.totalorder %v3050_v19, %v2915_v25  ;;  %v1700_v19 = vld [vmem:[%s3638_s7 + $0x8] sm:$0xff] }
 0x1ff   : > { %2369 = vmatpush.bf16.msk.msrb.mxu3 %vm2368_vm2, %v2604_v39  ;;  %vm1673_vm2 = vcmp.eq.s32.totalorder %v3043_v16, %v2915_v25 }
 0x200   : > { %v820_v12 = vmax.f32 %v3225_v37, %v3228_v32 }
 0x202   : > { %821 = vmax.xlane.f32.xlu0 %v820_v12  ;;  %2355 = vmatpush.bf16.msk.msra.mxu2 %vm2354_vm7, %v2604_v39  ;;  %vm1671_vm7 = vcmp.eq.s32.totalorder %v3069_v36, %v2915_v25 }
 0x203   : > { %2371 = vmatpush.bf16.msk.msrb.mxu3 %vm2370_vm8, %v2604_v39  ;;  %vm1687_vm8 = vcmp.eq.s32.totalorder %v3056_v22, %v2915_v25 }
 0x205   : > { %v729_v34 = vpop.f32.mrf.mxu2  ;;  %v778_v40 = vpop.f32.mrf.mxu3 }
 0x206   : > { %v3253_v42 = vadd.f32 %v729_v34, %v2925_v29  ;;  %v3256_v43 = vadd.f32 %v778_v40, %v2927_v30  ;;  %2357 = vmatpush.bf16.msk.msra.mxu2 %vm2356_vm13, %v2604_v39  ;;  %vm1685_vm13 = vcmp.eq.s32.totalorder %v3084_v48, %v2915_v25 }
 0x207   : > { %2373 = vmatpush.bf16.msk.msrb.mxu3 %vm2372_vm14, %v2604_v39  ;;  %vm1684_vm14 = vcmp.eq.s32.totalorder %v3114_v11, %v2915_v25 }
 0x208   : > { %v823_v46 = vmax.f32 %v3253_v42, %v3256_v43 }
 0x20a   : > { %824 = vmax.xlane.f32.xlu1 %v823_v46 }
 0x20d   : > { %v731_v27 = vpop.f32.mrf.mxu2  ;;  %v780_v20 = vpop.f32.mrf.mxu3 }
 0x20e   : > { %v3326_v21 = vadd.f32 %v731_v27, %v2925_v29 }
 0x212   : > { %1768 = vperm.xlu2 %2463, %v1706_v51  }
 0x215   : > { %v783_v34 = vpop.f32.mrf.mxu3 }
 0x216   : > { %1853 = vperm.xlu0 %2464, %v1723_v52   ;;  %v3343_v51 = vadd.f32 %v783_v34, %v2927_v30 }
 0x223   : > { %1773 = vperm.xlu1 %2462, %v1707_v58  }
 0x227   : > { %v795_v59 = vpop.xlane.xlu0 %794 }
 0x228   : > { %v841_v0 = vsub.f32 %v2962_v49, %v795_v59  ;;  %v842_v4 = vsub.f32 %v2965_v50, %v795_v59  ;;  %v3329_v49 = vadd.f32 %v780_v20, %v2927_v30 }
 0x22a   : > { %v873_v61 = vmul.f32 1.442695, %v841_v0  ;;  %v875_v53 = vmul.f32 1.442695, %v842_v4 }
 0x22c   : > { %2467 = vpow2.f32 %v873_v61 }
 0x22d   : > { %2469 = vpow2.f32 %v875_v53 }
 0x22f   : > { %v798_v56 = vpop.xlane.xlu0 %797 }
 0x230   : > { %v843_v5 = vsub.f32 %v3017_v6, %v798_v56  ;;  %v844_v10 = vsub.f32 %v3020_v7, %v798_v56  ;;  %v734_v6 = vpop.f32.mrf.mxu2  ;;  %v826_v7 = vmax.f32 %v3326_v21, %v3329_v49 }
 0x231   : > { %v3340_v46 = vadd.f32 %v734_v6, %v2925_v29 }
 0x232   : > { %v877_v39 = vmul.f32 1.442695, %v843_v5  ;;  %v879_v15 = vmul.f32 1.442695, %v844_v10  ;;  %v3331_v26 = vpop.eup %2467 }
 0x233   : > { %v3333_v12 = vpop.eup %2469  ;;  %v829_v61 = vmax.f32 %v3340_v46, %v3343_v51 }
 0x234   : > { %2471 = vpow2.f32 %v877_v39  ;;  %v785_v39 = vpop.f32.mrf.mxu3 }
 0x235   : > { %2473 = vpow2.f32 %v879_v15 }
 0x237   : > { %v801_v50 = vpop.xlane.xlu1 %800 }
 0x238   : > { %v845_v52 = vsub.f32 %v3073_v41, %v801_v50  ;;  %v846_v59 = vsub.f32 %v3076_v44, %v801_v50  ;;  %v736_v10 = vpop.f32.mrf.mxu2  ;;  %v3361_v50 = vadd.f32 %v785_v39, %v2927_v30  ;;  %v1720_v39 = vld [vmem:[%s3638_s7 + $0xa8] sm:$0xff] }
 0x239   : > { %v3358_v15 = vadd.f32 %v736_v10, %v2925_v29 }
 0x23a   : > { %v3337_v40 = vpop.eup %2471  ;;  %v881_v27 = vmul.f32 1.442695, %v845_v52  ;;  %v883_v41 = vmul.f32 1.442695, %v846_v59 }
 0x23b   : > { %v3346_v58 = vpop.eup %2473  ;;  %827 = vmax.xlane.f32.xlu2 %v826_v7  ;;  %v1231_v0 = vpack.c.bf16 %v3337_v40, %v3331_v26  ;;  %v832_v7 = vmax.f32 %v3358_v15, %v3361_v50 }
 0x23c   : > { %v1232_v4 = vpack.c.bf16 %v3346_v58, %v3333_v12  ;;  %2475 = vpow2.f32 %v881_v27  ;;  %v1721_v27 = vld [vmem:[%s3638_s7 + $0xb0] sm:$0xff] }
 0x23d   : > { %1255 = vmatmul.bf16.vlgmr.msrb.gmra.mxu0 %v1231_v0  ;;  %1353 = vmatmul.bf16.vlgmr.msra.gmra.mxu2 %v1231_v0  ;;  %2477 = vpow2.f32 %v883_v41  ;;  %v1705_v41 = vld [vmem:[%s3638_s7 + $0x30] sm:$0xff] }
 0x23e   : > { %1304 = vmatmul.bf16.vlgmr.msrb.gmra.mxu1 %v1232_v4  ;;  %1402 = vmatmul.bf16.vlgmr.msrb.gmra.mxu3 %v1232_v4 }
 0x23f   : > { %v804_v20 = vpop.xlane.xlu1 %803 }
 0x240   : > { %v847_v53 = vsub.f32 %v3124_v28, %v804_v20  ;;  %v848_v44 = vsub.f32 %v3127_v31, %v804_v20  ;;  %830 = vmax.xlane.f32.xlu0 %v829_v61 }
 0x242   : > { %v885_v56 = vmul.f32 1.442695, %v847_v53  ;;  %v887_v5 = vmul.f32 1.442695, %v848_v44  ;;  %v3363_v6 = vpop.eup %2475 }
 0x243   : > { %v3365_v28 = vpop.eup %2477 }
 0x244   : > { %2479 = vpow2.f32 %v885_v56 }
 0x245   : > { %2481 = vpow2.f32 %v887_v5 }
 0x24a   : > { %v3367_v31 = vpop.eup %2479 }
 0x24b   : > { %v3369_v34 = vpop.eup %2481  ;;  %v1233_v52 = vpack.c.bf16 %v3367_v31, %v3363_v6 }
 0x24c   : > { %v1234_v59 = vpack.c.bf16 %v3369_v34, %v3365_v28 }
 0x24d   : > { %v807_v0 = vpop.xlane.xlu2 %806  ;;  %833 = vmax.xlane.f32.xlu1 %v832_v7  ;;  %1260 = vmatmul.bf16.gmra.mxu0 %v1233_v52 }
 0x24e   : > { %1309 = vmatmul.bf16.gmra.mxu1 %v1234_v59  ;;  %1358 = vmatmul.bf16.gmra.mxu2 %v1233_v52  ;;  %v849_v4 = vsub.f32 %v3172_v13, %v807_v0  ;;  %v850_v61 = vsub.f32 %v3175_v47, %v807_v0  ;;  %v1703_v47 = vld [vmem:[%s3638_s7 + $0x20] sm:$0xff] }
 0x24f   : > { %1407 = vmatmul.bf16.gmra.mxu3 %v1234_v59 }
 0x250   : > { %v889_v20 = vmul.f32 1.442695, %v849_v4  ;;  %v891_v53 = vmul.f32 1.442695, %v850_v61 }
 0x252   : > { %2483 = vpow2.f32 %v889_v20 }
 0x253   : > { %1843 = vperm.xlu2 %2463, %v1721_v27   ;;  %2485 = vpow2.f32 %v891_v53 }
 0x254   : > { %1763 = vperm.xlu0 %2464, %v1705_v41   ;;  %v1722_v41 = vld [vmem:[%s3638_s7 + $0xb8] sm:$0xff] }
 0x255   : > { %v810_v44 = vpop.xlane.xlu2 %809 }
 0x256   : > { %v851_v56 = vsub.f32 %v3180_v1, %v810_v44  ;;  %v852_v5 = vsub.f32 %v3183_v2, %v810_v44 }
 0x258   : > { %v893_v13 = vmul.f32 1.442695, %v851_v56  ;;  %v895_v10 = vmul.f32 1.442695, %v852_v5  ;;  %v3393_v1 = vpop.eup %2483 }
 0x259   : > { %v3395_v2 = vpop.eup %2485 }
 0x25a   : > { %2487 = vpow2.f32 %v893_v13  ;;  %v1704_v13 = vld [vmem:[%s3638_s7 + $0x28] sm:$0xff] }
 0x25b   : > { %2489 = vpow2.f32 %v895_v10  ;;  %1753 = vperm.xlu2 %2463, %v1703_v47  }
 0x25c   : > { %1838 = vperm.xlu0 %2464, %v1720_v39  }
 0x25d   : > { %v813_v7 = vpop.xlane.xlu0 %812 }
 0x25e   : > { %v853_v59 = vsub.f32 %v3188_v17, %v813_v7  ;;  %v854_v4 = vsub.f32 %v3191_v33, %v813_v7 }
 0x260   : > { %v3397_v52 = vpop.eup %2487  ;;  %v897_v20 = vmul.f32 1.442695, %v853_v59  ;;  %v899_v17 = vmul.f32 1.442695, %v854_v4 }
 0x261   : > { %v3400_v0 = vpop.eup %2489  ;;  %v1235_v27 = vpack.c.bf16 %v3397_v52, %v3393_v1 }
 0x262   : > { %v1236_v61 = vpack.c.bf16 %v3400_v0, %v3395_v2  ;;  %2491 = vpow2.f32 %v897_v20  ;;  %v1719_v20 = vld [vmem:[%s3638_s7 + $0xa0] sm:$0xff] }
 0x263   : > { %1265 = vmatmul.bf16.gmra.mxu0 %v1235_v27  ;;  %1363 = vmatmul.bf16.gmra.mxu2 %v1235_v27  ;;  %2493 = vpow2.f32 %v899_v17 }
 0x264   : > { %1314 = vmatmul.bf16.gmra.mxu1 %v1236_v61  ;;  %1412 = vmatmul.bf16.gmra.mxu3 %v1236_v61  ;;  %v739_v61 = vpop.f32.mrf.mxu2 }
 0x265   : > { %v816_v53 = vpop.xlane.xlu1 %815 }
 0x266   : > { %v855_v44 = vsub.f32 %v3196_v38, %v816_v53  ;;  %v856_v33 = vsub.f32 %v3199_v55, %v816_v53  ;;  %1848 = vperm.xlu1 %2462, %v1722_v41   ;;  %v788_v41 = vpop.f32.mrf.mxu3 }
 0x268   : > { %v901_v56 = vmul.f32 1.442695, %v855_v44  ;;  %v903_v5 = vmul.f32 1.442695, %v856_v33  ;;  %v3415_v47 = vpop.eup %2491 }
 0x269   : > { %v3417_v39 = vpop.eup %2493 }
 0x26a   : > { %2495 = vpow2.f32 %v901_v56 }
 0x26b   : > { %2497 = vpow2.f32 %v903_v5  ;;  %v1701_v5 = vld [vmem:[%s3638_s7 + $0x10] sm:$0xff] }
 0x26d   : > { %v819_v10 = vpop.xlane.xlu2 %818 }
 0x26e   : > { %1758 = vperm.xlu1 %2462, %v1704_v13   ;;  %v857_v55 = vsub.f32 %v3204_v54, %v819_v10  ;;  %v858_v59 = vsub.f32 %v3207_v57, %v819_v10  ;;  %v741_v13 = vpop.f32.mrf.mxu2  ;;  %v790_v10 = vpop.f32.mrf.mxu3 }
 0x270   : > { %v3419_v38 = vpop.eup %2495  ;;  %v905_v17 = vmul.f32 1.442695, %v857_v55  ;;  %v907_v54 = vmul.f32 1.442695, %v858_v59 }
 0x271   : > { %v3422_v7 = vpop.eup %2497  ;;  %v1237_v4 = vpack.c.bf16 %v3419_v38, %v3415_v47 }
 0x272   : > { %v1238_v27 = vpack.c.bf16 %v3422_v7, %v3417_v39  ;;  %2499 = vpow2.f32 %v905_v17 }
 0x273   : > { %1270 = vmatmul.bf16.gmra.mxu0 %v1237_v4  ;;  %1368 = vmatmul.bf16.gmra.mxu2 %v1237_v4  ;;  %2501 = vpow2.f32 %v907_v54 }
 0x274   : > { %1319 = vmatmul.bf16.gmra.mxu1 %v1238_v27  ;;  %1417 = vmatmul.bf16.gmra.mxu3 %v1238_v27  ;;  %v3450_v27 = vadd.f32 %v741_v13, %v2925_v29 }
 0x275   : > { %v822_v53 = vpop.xlane.xlu0 %821 }
 0x276   : > { %v859_v57 = vsub.f32 %v3225_v37, %v822_v53  ;;  %v860_v44 = vsub.f32 %v3228_v32, %v822_v53  ;;  %1833 = vperm.xlu1 %2462, %v1719_v20   ;;  %v3442_v37 = vadd.f32 %v739_v61, %v2925_v29  ;;  %v3445_v32 = vadd.f32 %v788_v41, %v2927_v30  ;;  %v1716_v29 = vld [vmem:[%s3638_s7 + $0x88] sm:$0xff] }
 0x277   : > { %v3453_v20 = vadd.f32 %v790_v10, %v2927_v30 }
 0x278   : > { %v909_v33 = vmul.f32 1.442695, %v859_v57  ;;  %v911_v56 = vmul.f32 1.442695, %v860_v44  ;;  %v3437_v55 = vpop.eup %2499  ;;  %v835_v41 = vmax.f32 %v3442_v37, %v3445_v32 }
 0x279   : > { %v3439_v59 = vpop.eup %2501  ;;  %v838_v30 = vmax.f32 %v3450_v27, %v3453_v20 }
 0x27a   : > { %2503 = vpow2.f32 %v909_v33  ;;  %v1769_v33 = vpop.permute.xlu2 %1768 }
 0x27b   : > { %2505 = vpow2.f32 %v911_v56  ;;  %v1702_v56 = vld [vmem:[%s3638_s7 + $0x18] sm:$0xff] }
 0x27d   : > { %v825_v57 = vpop.xlane.xlu1 %824 }
 0x27e   : > { %1743 = vperm.xlu1 %2462, %v1701_v5   ;;  %v1699_v5 = vld [vmem:[%s3638_s7] sm:$0xff]  ;;  %v861_v13 = vsub.f32 %v3253_v42, %v825_v57  ;;  %v862_v10 = vsub.f32 %v3256_v43, %v825_v57 }
 0x280   : > { %v3447_v4 = vpop.eup %2503 }
 0x281   : > { %v3455_v17 = vpop.eup %2505  ;;  %v1239_v54 = vpack.c.bf16 %v3447_v4, %v3437_v55 }
 0x282   : > { %v1240_v61 = vpack.c.bf16 %v3455_v17, %v3439_v59 }
 0x283   : > { %1275 = vmatmul.bf16.gmra.mxu0 %v1239_v54  ;;  %1373 = vmatmul.bf16.gmra.mxu2 %v1239_v54  ;;  %v1715_v54 = vld [vmem:[%s3638_s7 + $0x80] sm:$0xff] }
 0x284   : > { %1324 = vmatmul.bf16.gmra.mxu1 %v1240_v61  ;;  %1422 = vmatmul.bf16.gmra.mxu3 %v1240_v61  ;;  %v913_v61 = vmul.f32 1.442695, %v861_v13 }
 0x285   : > { %836 = vmax.xlane.f32.xlu2 %v835_v41  ;;  %v915_v41 = vmul.f32 1.442695, %v862_v10 }
 0x286   : > { %1818 = vperm.xlu1 %2462, %v1716_v29   ;;  %839 = vmax.xlane.f32.xlu0 %v838_v30  ;;  %2507 = vpow2.f32 %v913_v61 }
 0x287   : > { %2509 = vpow2.f32 %v915_v41 }
 0x288   : > { %v1854_v53 = vpop.permute.xlu0 %1853 }
 0x289   : > { %2397 = vmatpush.msk.msra.mxu1 %vm1691_vm15, %v1854_v53  ;;  %vm1683_vm15 = vcmp.eq.s32.totalorder %v3110_v8, %v2915_v25 }
 0x28c   : > { %v3496_v42 = vpop.eup %2507 }
 0x28d   : > { %v3498_v43 = vpop.eup %2509 }
 0x295   : > { %v1774_v44 = vpop.permute.xlu1 %1773 }
 0x296   : > { %2381 = vmatpush.msk.msra.mxu0 %vm1675_vm0, %v1774_v44  ;;  %vm1667_vm0 = vcmp.eq.s32.totalorder %v3119_v18, %v2915_v25 }
 0x298   : > { %2382 = vmatpush.msk.msra.mxu0 %vm1674_vm1, %v1769_v33 }
 0x29a   : > { %1748 = vperm.xlu0 %2464, %v1702_v56  }
 0x29d   : > { %1828 = vperm.xlu2 %2463, %v1718_v35  }
 0x2a2   : > { %1823 = vperm.xlu0 %2464, %v1717_v3  }
 0x2a5   : > { %1738 = vperm.xlu2 %2463, %v1700_v19  }
 0x2aa   : > { %1733 = vperm.xlu0 %2464, %v1699_v5  }
 0x2ad   : > { %1813 = vperm.xlu2 %2463, %v1715_v54  }
 0x2ae   : > { %v828_v29 = vpop.xlane.xlu2 %827 }
 0x2af   : > { %v863_v30 = vsub.f32 %v3326_v21, %v828_v29  ;;  %v864_v53 = vsub.f32 %v3329_v49, %v828_v29 }
 0x2b1   : > { %v917_v44 = vmul.f32 1.442695, %v863_v30  ;;  %v919_v33 = vmul.f32 1.442695, %v864_v53 }
 0x2b3   : > { %2511 = vpow2.f32 %v917_v44  ;;  %v831_v57 = vpop.xlane.xlu0 %830 }
 0x2b4   : > { %2513 = vpow2.f32 %v919_v33  ;;  %v865_v49 = vsub.f32 %v3340_v46, %v831_v57  ;;  %v866_v19 = vsub.f32 %v3343_v51, %v831_v57 }
 0x2b6   : > { %v921_v5 = vmul.f32 1.442695, %v865_v49  ;;  %v923_v13 = vmul.f32 1.442695, %v866_v19  ;;  %v1844_v16 = vpop.permute.xlu2 %1843 }
 0x2b8   : > { %2515 = vpow2.f32 %v921_v5 }
 0x2b9   : > { %v3500_v56 = vpop.eup %2511  ;;  %2517 = vpow2.f32 %v923_v13 }
 0x2ba   : > { %v3502_v35 = vpop.eup %2513  ;;  %v1241_v21 = vpack.c.bf16 %v3500_v56, %v3496_v42  ;;  %v1256_v19 = vpop.f32.mrf.mxu0 }
 0x2bb   : > { %v1242_v3 = vpack.c.bf16 %v3502_v35, %v3498_v43  ;;  %v1305_v9 = vpop.f32.mrf.mxu1 }
 0x2bc   : > { %1280 = vmatmul.bf16.gmra.mxu0 %v1241_v21  ;;  %1378 = vmatmul.bf16.gmra.mxu2 %v1241_v21 }
 0x2bd   : > { %1329 = vmatmul.bf16.gmra.mxu1 %v1242_v3  ;;  %1427 = vmatmul.bf16.gmra.mxu3 %v1242_v3 }
 0x2be   : > { %v3514_v51 = vpop.eup %2515  ;;  %v1754_v14 = vpop.permute.xlu2 %1753 }
 0x2bf   : > { %v3516_v30 = vpop.eup %2517 }
 0x2c0   : > { %v834_v10 = vpop.xlane.xlu1 %833  ;;  %v1354_v21 = vpop.f32.mrf.mxu2 }
 0x2c1   : > { %v867_v54 = vsub.f32 %v3358_v15, %v834_v10  ;;  %v868_v61 = vsub.f32 %v3361_v50, %v834_v10  ;;  %v1403_v49 = vpop.f32.mrf.mxu3 }
 0x2c2   : > { %v1258_v10 = vpop.f32.mrf.mxu0 }
 0x2c3   : > { %v925_v41 = vmul.f32 1.442695, %v867_v54  ;;  %v927_v29 = vmul.f32 1.442695, %v868_v61  ;;  %v1307_v45 = vpop.f32.mrf.mxu1 }
 0x2c5   : > { %2519 = vpow2.f32 %v925_v41  ;;  %v1404_v41 = vadd.f32 %v1403_v49, %v1354_v21 }
 0x2c6   : > { %2521 = vpow2.f32 %v927_v29  ;;  %v1764_v46 = vpop.permute.xlu0 %1763 }
 0x2c7   : > { %2383 = vmatpush.msk.msra.mxu0 %vm1673_vm2, %v1764_v46 }
 0x2c8   : > { %v1356_v5 = vpop.f32.mrf.mxu2 }
 0x2c9   : > { %v1405_v13 = vpop.f32.mrf.mxu3 }
 0x2ca   : > { %v1261_v29 = vpop.f32.mrf.mxu0 }
 0x2cb   : > { %v3518_v53 = vpop.eup %2519  ;;  %v1310_v46 = vpop.f32.mrf.mxu1 }
 0x2cc   : > { %3645 = vst [vmem:[#allocation2_spill] sm:$0xff] %v3518_v53  ;;  %v3520_v15 = vpop.eup %2521  ;;  %v1243_v50 = vpack.c.bf16 %v3518_v53, %v3514_v51 }
 0x2cd   : > { %3646 = vst [vmem:[#allocation3_spill] sm:$0xff] %v3520_v15  ;;  %v1244_v44 = vpack.c.bf16 %v3520_v15, %v3516_v30 }
 0x2ce   : > { %1285 = vmatmul.bf16.gmra.mxu0 %v1243_v50  ;;  %1383 = vmatmul.bf16.gmra.mxu2 %v1243_v50  ;;  %v1839_v57 = vpop.permute.xlu0 %1838  ;;  %v1444_v50 = vmax.f32 %v1404_v41, 1e-30  ;;  %v1406_v41 = vadd.f32 %v1405_v13, %v1356_v5 }
 0x2cf   : > { %1334 = vmatmul.bf16.gmra.mxu1 %v1244_v44  ;;  %1432 = vmatmul.bf16.gmra.mxu3 %v1244_v44 }
 0x2d0   : > { %2523 = vrcp.f32 %v1444_v50 }
 0x2d1   : > { %v1359_v54 = vpop.f32.mrf.mxu2 }
 0x2d2   : > { %v1408_v61 = vpop.f32.mrf.mxu3 }
 0x2d8   : > { %v1849_v33 = vpop.permute.xlu1 %1848 }
 0x2d9   : > { %2398 = vmatpush.msk.msra.mxu1 %vm1690_vm3, %v1849_v33  ;;  %v1361_v15 = vpop.f32.mrf.mxu2 }
 0x2da   : > { %v1410_v21 = vpop.f32.mrf.mxu3 }
 0x2db   : > { %2399 = vmatpush.msk.msra.mxu1 %vm1689_vm4, %v1844_v16 }
 0x2dd   : > { %2400 = vmatpush.msk.msra.mxu1 %vm1688_vm5, %v1839_v57  ;;  %v1306_v57 = vadd.f32 %v1305_v9, %v1256_v19  ;;  %v1263_v19 = vpop.f32.mrf.mxu0  ;;  %v1312_v9 = vpop.f32.mrf.mxu1 }
 0x2e0   : > { %v1759_v3 = vpop.permute.xlu1 %1758 }
 0x2e1   : > { %2384 = vmatpush.msk.msra.mxu0 %vm1672_vm6, %v1759_v3 }
 0x2e3   : > { %2385 = vmatpush.msk.msra.mxu0 %vm1671_vm7, %v1754_v14 }
 0x2e7   : > { %v1413_v5 = vpop.f32.mrf.mxu3 }
 0x2e8   : > { %v1834_v23 = vpop.permute.xlu1 %1833 }
 0x2e9   : > { %2401 = vmatpush.msk.msra.mxu1 %vm1687_vm8, %v1834_v23 }
 0x2f8   : > { %v837_v36 = vpop.xlane.xlu2 %836 }
 0x2f9   : > { %v869_v44 = vsub.f32 %v3442_v37, %v837_v36  ;;  %v870_v16 = vsub.f32 %v3445_v32, %v837_v36  ;;  %v840_v33 = vpop.xlane.xlu0 %839  ;;  %v1443_v37 = vmax.f32 %v1306_v57, 1e-30  ;;  %v1446_v36 = vmax.f32 %v1406_v41, 1e-30  ;;  %v1364_v57 = vpop.f32.mrf.mxu2 }
 0x2fa   : > { %v871_v14 = vsub.f32 %v3450_v27, %v840_v33  ;;  %v872_v23 = vsub.f32 %v3453_v20, %v840_v33  ;;  %v1308_v27 = vadd.f32 %v1307_v45, %v1258_v10  ;;  %v2524_v20 = vpop.eup %2523 }
 0x2fb   : > { %v929_v22 = vmul.f32 1.442695, %v869_v44  ;;  %v931_v3 = vmul.f32 1.442695, %v870_v16  ;;  %v1508_v45 = vmul.f32 %v2524_v20, %v1444_v50  ;;  %v1744_v50 = vpop.permute.xlu1 %1743 }
 0x2fc   : > { %v933_v53 = vmul.f32 1.442695, %v871_v14  ;;  %v935_v49 = vmul.f32 1.442695, %v872_v23  ;;  %v1445_v60 = vmax.f32 %v1308_v27, 1e-30  ;;  %v3556_v14 = vpop.f32.mrf.mxu0  ;;  %v1315_v23 = vpop.f32.mrf.mxu1 }
 0x2fd   : > { %2525 = vpow2.f32 %v929_v22  ;;  %v1540_v41 = vsub.f32 2.0, %v1508_v45  ;;  %v1415_v45 = vpop.f32.mrf.mxu3  ;;  %v1316_v8 = vadd.f32 %v1315_v23, %v3556_v14 }
 0x2fe   : > { %2527 = vpow2.f32 %v931_v3 }
 0x2ff   : > { %2529 = vpow2.f32 %v933_v53  ;;  %v1409_v53 = vadd.f32 %v1408_v61, %v1359_v54  ;;  %v1311_v54 = vadd.f32 %v1310_v46, %v1261_v29  ;;  %v1572_v46 = vmul.f32 %v2524_v20, %v1540_v41 }
 0x300   : > { %v1829_v32 = vpop.permute.xlu2 %1828  ;;  %2531 = vpow2.f32 %v935_v49 }
 0x301   : > { %2402 = vmatpush.msk.msra.mxu1 %vm1686_vm9, %v1829_v32  ;;  %2533 = vrcp.f32 %v1443_v37  ;;  %v1448_v61 = vmax.f32 %v1409_v53, 1e-30  ;;  %v1366_v53 = vpop.f32.mrf.mxu2 }
 0x302   : > { %2535 = vrcp.f32 %v1446_v36 }
 0x303   : > { %v3544_v44 = vpop.eup %2525  ;;  %2537 = vrcp.f32 %v1445_v60 }
 0x304   : > { %v3546_v16 = vpop.eup %2527  ;;  %2539 = vrcp.f32 %v1448_v61 }
 0x305   : > { %3647 = vst [vmem:[#allocation4_spill] sm:$0xff] %v3546_v16  ;;  %v3548_v33 = vpop.eup %2529 }
 0x306   : > { %3648 = vst [vmem:[#allocation5_spill] sm:$0xff] %v3548_v33  ;;  %v3550_v13 = vpop.eup %2531  ;;  %v1245_v10 = vpack.c.bf16 %v3548_v33, %v3544_v44  ;;  %v1313_v33 = vadd.f32 %v1312_v9, %v1263_v19  ;;  %v1819_v19 = vpop.permute.xlu1 %1818  ;;  %v1414_v9 = vadd.f32 %v1413_v5, %v1364_v57 }
 0x307   : > { %3649 = vst [vmem:[#allocation6_spill] sm:$0xff] %v3550_v13  ;;  %v1246_v22 = vpack.c.bf16 %v3550_v13, %v3546_v16  ;;  %v2534_v3 = vpop.eup %2533  ;;  %v1268_v16 = vpop.f32.mrf.mxu0 }
 0x308   : > { %1290 = vmatmul.bf16.gmra.mxu0 %v1245_v10  ;;  %1388 = vmatmul.bf16.gmra.mxu2 %v1245_v10  ;;  %v1507_v49 = vmul.f32 %v2534_v3, %v1443_v37  ;;  %v2536_v27 = vpop.eup %2535  ;;  %v1739_v13 = vpop.permute.xlu2 %1738  ;;  %v1447_v10 = vmax.f32 %v1311_v54, 1e-30  ;;  %v1604_v54 = vmul.f32 %v3333_v12, %v1572_v46 }
 0x309   : > { %1339 = vmatmul.bf16.gmra.mxu1 %v1246_v22  ;;  %1437 = vmatmul.bf16.gmra.mxu3 %v1246_v22  ;;  %v1411_v22 = vadd.f32 %v1410_v21, %v1361_v15  ;;  %v2538_v63 = vpop.eup %2537  ;;  %v1510_v37 = vmul.f32 %v2536_v27, %v1446_v36  ;;  %v1317_v21 = vpop.f32.mrf.mxu1  ;;  %v1449_v36 = vmax.f32 %v1313_v33, 1e-30  ;;  %v1452_v33 = vmax.f32 %v1414_v9, 1e-30 }
 0x30a   : > { %v1539_v29 = vsub.f32 2.0, %v1507_v49  ;;  %v1509_v62 = vmul.f32 %v2538_v63, %v1445_v60  ;;  %2541 = vrcp.f32 %v1447_v10  ;;  %v2540_v20 = vpop.eup %2539  ;;  %v1369_v11 = vpop.f32.mrf.mxu2 }
 0x30b   : > { %v1542_v15 = vsub.f32 2.0, %v1510_v37  ;;  %v1512_v12 = vmul.f32 %v2540_v20, %v1448_v61 }
 0x30c   : > { %v1749_v32 = vpop.permute.xlu0 %1748  ;;  %v1571_v24 = vmul.f32 %v2534_v3, %v1539_v29  ;;  %v1541_v48 = vsub.f32 2.0, %v1509_v62  ;;  %v1636_v3 = vmax.f32 %v1604_v54, 0.001  ;;  %v1416_v54 = vadd.f32 %v1415_v45, %v1366_v53 }
 0x30d   : > { %2386 = vmatpush.msk.msra.mxu0 %vm1670_vm10, %v1749_v32  ;;  %v1450_v32 = vmax.f32 %v1411_v22, 1e-30  ;;  %v1574_v49 = vmul.f32 %v2536_v27, %v1542_v15  ;;  %v1418_v22 = vpop.f32.mrf.mxu3 }
 0x30e   : > { %v1603_v60 = vmul.f32 %v3331_v26, %v1571_v24  ;;  %v1573_v57 = vmul.f32 %v2538_v63, %v1541_v48  ;;  %v1544_v26 = vsub.f32 2.0, %v1512_v12  ;;  %v1451_v24 = vmax.f32 %v1316_v8, 1e-30 }
 0x30f   : > { %2387 = vmatpush.msk.msra.mxu0 %vm1669_vm11, %v1744_v50  ;;  %2543 = vrcp.f32 %v1450_v32  ;;  %v1606_v46 = vmul.f32 %v3346_v58, %v1574_v49  ;;  %v1271_v37 = vpop.f32.mrf.mxu0  ;;  %v1454_v58 = vmax.f32 %v1416_v54, 1e-30 }
 0x310   : > { %v2542_v41 = vpop.eup %2541  ;;  %2545 = vrcp.f32 %v1449_v36  ;;  %v1635_v5 = vmax.f32 %v1603_v60, 0.001  ;;  %v1605_v25 = vmul.f32 %v3337_v40, %v1573_v57  ;;  %v1576_v15 = vmul.f32 %v2540_v20, %v1544_v26 }
 0x311   : > { %2388 = vmatpush.msk.msra.mxu0 %vm1668_vm12, %v1739_v13  ;;  %v1814_v13 = vpop.permute.xlu2 %1813  ;;  %v1511_v29 = vmul.f32 %v2542_v41, %v1447_v10  ;;  %v1320_v62 = vpop.f32.mrf.mxu1  ;;  %2547 = vrcp.f32 %v1452_v33  ;;  %v1638_v63 = vmax.f32 %v1606_v46, 0.001  ;;  %v1318_v10 = vadd.f32 %v1317_v21, %v1268_v16 }
 0x312   : > { %2549 = vrcp.f32 %v1451_v24  ;;  %v1371_v48 = vpop.f32.mrf.mxu2  ;;  %v1637_v60 = vmax.f32 %v1605_v25, 0.001  ;;  %v1608_v12 = vmul.f32 %v3365_v28, %v1576_v15  ;;  %v1321_v57 = vadd.f32 %v1320_v62, %v1271_v37 }
 0x313   : > { %v1543_v14 = vsub.f32 2.0, %v1511_v29  ;;  %v1453_v45 = vmax.f32 %v1318_v10, 1e-30  ;;  %2551 = vrcp.f32 %v1454_v58 }
 0x314   : > { %v1824_v50 = vpop.permute.xlu0 %1823  ;;  %v1640_v21 = vmax.f32 %v1608_v12, 0.001 }
 0x315   : > { %2403 = vmatpush.msk.msra.mxu1 %vm1685_vm13, %v1824_v50  ;;  %v2544_v27 = vpop.eup %2543  ;;  %v1420_v9 = vpop.f32.mrf.mxu3  ;;  %2553 = vrcp.f32 %v1453_v45 }
 0x316   : > { %v2546_v18 = vpop.eup %2545  ;;  %v1514_v23 = vmul.f32 %v2544_v27, %v1450_v32  ;;  %v1419_v32 = vadd.f32 %v1418_v22, %v1369_v11  ;;  %v1421_v54 = vadd.f32 %v1420_v9, %v1371_v48 }
 0x317   : > { %2404 = vmatpush.msk.msra.mxu1 %vm1684_vm14, %v1819_v19  ;;  %v1513_v50 = vmul.f32 %v2546_v18, %v1449_v36  ;;  %v2548_v53 = vpop.eup %2547  ;;  %v1273_v20 = vpop.f32.mrf.mxu0 }
 0x318   : > { %v1546_v19 = vsub.f32 2.0, %v1514_v23  ;;  %v2550_v8 = vpop.eup %2549 }
 0x319   : > { %2405 = vmatpush.msk.msra.mxu1 %vm1683_vm15, %v1814_v13  ;;  %v1575_v13 = vmul.f32 %v2542_v41, %v1543_v14  ;;  %v1545_v40 = vsub.f32 2.0, %v1513_v50  ;;  %v1322_v16 = vpop.f32.mrf.mxu1  ;;  %v1515_v41 = vmul.f32 %v2550_v8, %v1451_v24  ;;  %v2552_v46 = vpop.eup %2551 }
 0x31a   : > { %2004 = vmatmul.f32.vlgmr.msra.gmra.mxu1 %v1636_v3  ;;  %v1516_v3 = vmul.f32 %v2548_v53, %v1452_v33  ;;  %v1578_v49 = vmul.f32 %v2544_v27, %v1546_v19  ;;  %v1374_v11 = vpop.f32.mrf.mxu2  ;;  %v1455_v33 = vmax.f32 %v1321_v57, 1e-30  ;;  %v1518_v37 = vmul.f32 %v2552_v46, %v1454_v58 }
 0x31b   : > { %v1607_v36 = vmul.f32 %v3363_v6, %v1575_v13  ;;  %v1577_v28 = vmul.f32 %v2546_v18, %v1545_v40  ;;  %v2554_v27 = vpop.eup %2553  ;;  %v1547_v25 = vsub.f32 2.0, %v1515_v41  ;;  %v1323_v18 = vadd.f32 %v1322_v16, %v1273_v20 }
 0x31c   : > { %v1734_v61 = vpop.permute.xlu0 %1733  ;;  %v1548_v29 = vsub.f32 2.0, %v1516_v3  ;;  %v1550_v15 = vsub.f32 2.0, %v1518_v37 }
 0x31d   : > { %2389 = vmatpush.msk.msra.mxu0 %vm1667_vm0, %v1734_v61  ;;  %v1639_v26 = vmax.f32 %v1607_v36, 0.001  ;;  %v1610_v61 = vmul.f32 %v3369_v34, %v1578_v49  ;;  %v1423_v22 = vpop.f32.mrf.mxu3  ;;  %v1609_v6 = vmul.f32 %v3367_v31, %v1577_v28  ;;  %v1458_v34 = vmax.f32 %v1421_v54, 1e-30 }
 0x31e   : > { %1939 = vmatmul.f32.vlgmr.msra.gmra.mxu0 %v1635_v5  ;;  %v1456_v5 = vmax.f32 %v1419_v32, 1e-30  ;;  %v1580_v14 = vmul.f32 %v2548_v53, %v1548_v29  ;;  %v1579_v19 = vmul.f32 %v2550_v8, %v1547_v25  ;;  %v1457_v9 = vmax.f32 %v1323_v18, 1e-30 }
 0x31f   : > { %v1642_v62 = vmax.f32 %v1610_v61, 0.001  ;;  %v1276_v24 = vpop.f32.mrf.mxu0  ;;  %v1641_v10 = vmax.f32 %v1609_v6, 0.001  ;;  %v1582_v58 = vmul.f32 %v2552_v46, %v1550_v15 }
 0x320   : > { %2555 = vrcp.f32 %v1456_v5  ;;  %v1612_v50 = vmul.f32 %v3395_v2, %v1580_v14 }
 0x321   : > { %v1325_v23 = vpop.f32.mrf.mxu1  ;;  %2557 = vrcp.f32 %v1455_v33  ;;  %v1614_v57 = vmul.f32 %v3400_v0, %v1582_v58 }
 0x322   : > { %2007 = vmatmul.f32.gmra.mxu1 %v1638_v63  ;;  %v1517_v63 = vmul.f32 %v2554_v27, %v1453_v45  ;;  %2559 = vrcp.f32 %v1458_v34  ;;  %v1376_v13 = vpop.f32.mrf.mxu2  ;;  %v1644_v40 = vmax.f32 %v1612_v50, 0.001  ;;  %v1611_v45 = vmul.f32 %v3393_v1, %v1579_v19 }
 0x323   : > { %2561 = vrcp.f32 %v1457_v9  ;;  %v1326_v3 = vadd.f32 %v1325_v23, %v1276_v24 }
 0x324   : > { %v1549_v31 = vsub.f32 2.0, %v1517_v63  ;;  %v1643_v8 = vmax.f32 %v1611_v45, 0.001 }
 0x325   : > { %v1425_v53 = vpop.f32.mrf.mxu3 }
 0x326   : > { %1942 = vmatmul.f32.gmra.mxu0 %v1637_v60  ;;  %v2556_v48 = vpop.eup %2555  ;;  %v1424_v60 = vadd.f32 %v1423_v22, %v1374_v11  ;;  %v1581_v2 = vmul.f32 %v2554_v27, %v1549_v31  ;;  %v1426_v41 = vadd.f32 %v1425_v53, %v1376_v13 }
 0x327   : > { %v1520_v12 = vmul.f32 %v2556_v48, %v1456_v5  ;;  %v2558_v32 = vpop.eup %2557  ;;  %v1278_v36 = vpop.f32.mrf.mxu0  ;;  %v1459_v5 = vmax.f32 %v1326_v3, 1e-30 }
 0x328   : > { %v1460_v20 = vmax.f32 %v1424_v60, 1e-30  ;;  %v1519_v16 = vmul.f32 %v2558_v32, %v1455_v33  ;;  %v2560_v28 = vpop.eup %2559  ;;  %v1613_v1 = vmul.f32 %v3397_v52, %v1581_v2  ;;  %v1646_v33 = vmax.f32 %v1614_v57, 0.001 }
 0x329   : > { %v1327_v49 = vpop.f32.mrf.mxu1  ;;  %v2562_v29 = vpop.eup %2561  ;;  %v1522_v46 = vmul.f32 %v2560_v28, %v1458_v34  ;;  %v1462_v27 = vmax.f32 %v1426_v41, 1e-30 }
 0x32a   : > { %2010 = vmatmul.f32.gmra.mxu1 %v1640_v21  ;;  %v1552_v21 = vsub.f32 2.0, %v1520_v12  ;;  %2563 = vrcp.f32 %v1460_v20  ;;  %v1328_v54 = vadd.f32 %v1327_v49, %v1278_v36  ;;  %v1521_v6 = vmul.f32 %v2562_v29, %v1457_v9 }
 0x32b   : > { %2565 = vrcp.f32 %v1459_v5  ;;  %v1554_v0 = vsub.f32 2.0, %v1522_v46  ;;  %v1645_v37 = vmax.f32 %v1613_v1, 0.001 }
 0x32c   : > { %v1584_v61 = vmul.f32 %v2556_v48, %v1552_v21  ;;  %v1461_v24 = vmax.f32 %v1328_v54, 1e-30  ;;  %v1553_v23 = vsub.f32 2.0, %v1521_v6  ;;  %2567 = vrcp.f32 %v1462_v27 }
 0x32d   : > { %v1586_v34 = vmul.f32 %v2560_v28, %v1554_v0 }
 0x32e   : > { %1945 = vmatmul.f32.gmra.mxu0 %v1639_v26  ;;  %v1551_v26 = vsub.f32 2.0, %v1519_v16  ;;  %2569 = vrcp.f32 %v1461_v24 }
 0x32f   : > { %v1618_v53 = vmul.f32 %v3422_v7, %v1586_v34 }
 0x330   : > { %v1583_v18 = vmul.f32 %v2558_v32, %v1551_v26  ;;  %v2564_v52 = vpop.eup %2563 }
 0x331   : > { %v1524_v15 = vmul.f32 %v2564_v52, %v1460_v20  ;;  %v2566_v19 = vpop.eup %2565  ;;  %v1650_v49 = vmax.f32 %v1618_v53, 0.001 }
 0x332   : > { %2013 = vmatmul.f32.gmra.mxu1 %v1642_v62  ;;  %v1616_v62 = vmul.f32 %v3417_v39, %v1584_v61  ;;  %v1615_v50 = vmul.f32 %v3415_v47, %v1583_v18  ;;  %v1585_v39 = vmul.f32 %v2562_v29, %v1553_v23  ;;  %v1523_v58 = vmul.f32 %v2566_v19, %v1459_v5 }
 0x333   : > { %v1556_v12 = vsub.f32 2.0, %v1524_v15 }
 0x334   : > { %v1647_v13 = vmax.f32 %v1615_v50, 0.001  ;;  %v1617_v20 = vmul.f32 %v3419_v38, %v1585_v39  ;;  %v1555_v16 = vsub.f32 2.0, %v1523_v58 }
 0x335   : > { %v1588_v21 = vmul.f32 %v2564_v52, %v1556_v12 }
 0x336   : > { %1948 = vmatmul.f32.gmra.mxu0 %v1641_v10  ;;  %v1648_v10 = vmax.f32 %v1616_v62, 0.001  ;;  %v1587_v41 = vmul.f32 %v2566_v19, %v1555_v16  ;;  %v1649_v29 = vmax.f32 %v1617_v20, 0.001 }
 0x337   : > { %v1620_v26 = vmul.f32 %v3439_v59, %v1588_v21 }
 0x338   : > { %v1619_v0 = vmul.f32 %v3437_v55, %v1587_v41 }
 0x339   : > { %v1281_v25 = vpop.f32.mrf.mxu0 }
 0x33a   : > { %2016 = vmatmul.f32.gmra.mxu1 %v1644_v40  ;;  %v1330_v14 = vpop.f32.mrf.mxu1  ;;  %v2568_v40 = vpop.eup %2567  ;;  %v1651_v23 = vmax.f32 %v1619_v0, 0.001 }
 0x33b   : > { %v1331_v31 = vadd.f32 %v1330_v14, %v1281_v25  ;;  %v2570_v2 = vpop.eup %2569  ;;  %v1526_v36 = vmul.f32 %v2568_v40, %v1462_v27  ;;  %v1652_v27 = vmax.f32 %v1620_v26, 0.001 }
 0x33c   : > { %v1525_v5 = vmul.f32 %v2570_v2, %v1461_v24 }
 0x33d   : > { %v1463_v3 = vmax.f32 %v1331_v31, 1e-30  ;;  %v1558_v1 = vsub.f32 2.0, %v1526_v36 }
 0x33e   : > { %1951 = vmatmul.f32.gmra.mxu0 %v1643_v8 }
 0x33f   : > { %v1379_v11 = vpop.f32.mrf.mxu2  ;;  %v1590_v54 = vmul.f32 %v2568_v40, %v1558_v1 }
 0x340   : > { %v1428_v22 = vpop.f32.mrf.mxu3 }
 0x341   : > { %v1429_v63 = vadd.f32 %v1428_v22, %v1379_v11  ;;  %v1283_v45 = vpop.f32.mrf.mxu0  ;;  %v1557_v22 = vsub.f32 2.0, %v1525_v5 }
 0x342   : > { %2019 = vmatmul.f32.gmra.mxu1 %v1646_v33  ;;  %v1332_v32 = vpop.f32.mrf.mxu1 }
 0x343   : > { %v1464_v60 = vmax.f32 %v1429_v63, 1e-30  ;;  %v1333_v8 = vadd.f32 %v1332_v32, %v1283_v45  ;;  %v1589_v14 = vmul.f32 %v2570_v2, %v1557_v22  ;;  %v1622_v63 = vmul.f32 %v3455_v17, %v1590_v54 }
 0x345   : > { %2571 = vrcp.f32 %v1464_v60  ;;  %v1465_v46 = vmax.f32 %v1333_v8, 1e-30  ;;  %v1621_v55 = vmul.f32 %v3447_v4, %v1589_v14  ;;  %v1654_v39 = vmax.f32 %v1622_v63, 0.001  ;;  %v3651_v14 = vld [vmem:[#allocation2_spill] sm:$0xff] }
 0x346   : > { %1954 = vmatmul.f32.gmra.mxu0 %v1645_v37  ;;  %2573 = vrcp.f32 %v1463_v3 }
 0x347   : > { %v1381_v48 = vpop.f32.mrf.mxu2  ;;  %v1653_v40 = vmax.f32 %v1621_v55, 0.001 }
 0x348   : > { %v1430_v9 = vpop.f32.mrf.mxu3 }
 0x349   : > { %v1431_v47 = vadd.f32 %v1430_v9, %v1381_v48 }
 0x34a   : > { %2022 = vmatmul.f32.gmra.mxu1 %v1648_v10 }
 0x34b   : > { %v1466_v7 = vmax.f32 %v1431_v47, 1e-30  ;;  %v2572_v61 = vpop.eup %2571  ;;  %v1286_v38 = vpop.f32.mrf.mxu0 }
 0x34c   : > { %v1335_v11 = vpop.f32.mrf.mxu1  ;;  %v1528_v6 = vmul.f32 %v2572_v61, %v1464_v60  ;;  %v2574_v25 = vpop.eup %2573 }
 0x34d   : > { %2575 = vrcp.f32 %v1466_v7  ;;  %v1336_v37 = vadd.f32 %v1335_v11, %v1286_v38  ;;  %v1527_v59 = vmul.f32 %v2574_v25, %v1463_v3 }
 0x34e   : > { %1957 = vmatmul.f32.gmra.mxu0 %v1647_v13  ;;  %2577 = vrcp.f32 %v1465_v46  ;;  %v1560_v18 = vsub.f32 2.0, %v1528_v6 }
 0x34f   : > { %v1467_v15 = vmax.f32 %v1336_v37, 1e-30  ;;  %v1559_v19 = vsub.f32 2.0, %v1527_v59 }
 0x350   : > { %v1592_v48 = vmul.f32 %v2572_v61, %v1560_v18 }
 0x351   : > { %v1384_v57 = vpop.f32.mrf.mxu2  ;;  %v1591_v17 = vmul.f32 %v2574_v25, %v1559_v19 }
 0x352   : > { %v1433_v28 = vpop.f32.mrf.mxu3  ;;  %2025 = vmatmul.f32.gmra.mxu1 %v1650_v49  ;;  %v1624_v45 = vmul.f32 %v3498_v43, %v1592_v48 }
 0x353   : > { %v1434_v33 = vadd.f32 %v1433_v28, %v1384_v57  ;;  %v2576_v34 = vpop.eup %2575  ;;  %v1288_v31 = vpop.f32.mrf.mxu0  ;;  %v1623_v16 = vmul.f32 %v3496_v42, %v1591_v17 }
 0x354   : > { %v2578_v50 = vpop.eup %2577  ;;  %v1530_v9 = vmul.f32 %v2576_v34, %v1466_v7  ;;  %v1337_v60 = vpop.f32.mrf.mxu1  ;;  %v1656_v2 = vmax.f32 %v1624_v45, 0.001 }
 0x355   : > { %v1468_v62 = vmax.f32 %v1434_v33, 1e-30  ;;  %v1529_v58 = vmul.f32 %v2578_v50, %v1465_v46  ;;  %v1338_v12 = vadd.f32 %v1337_v60, %v1288_v31  ;;  %v1655_v57 = vmax.f32 %v1623_v16, 0.001 }
 0x356   : > { %1960 = vmatmul.f32.gmra.mxu0 %v1649_v29  ;;  %v1562_v53 = vsub.f32 2.0, %v1530_v9 }
 0x357   : > { %2579 = vrcp.f32 %v1468_v62  ;;  %v1561_v4 = vsub.f32 2.0, %v1529_v58  ;;  %v1469_v3 = vmax.f32 %v1338_v12, 1e-30 }
 0x358   : > { %2581 = vrcp.f32 %v1467_v15  ;;  %v1594_v47 = vmul.f32 %v2576_v34, %v1562_v53 }
 0x359   : > { %v1386_v52 = vpop.f32.mrf.mxu2  ;;  %v1593_v36 = vmul.f32 %v2578_v50, %v1561_v4 }
 0x35a   : > { %2028 = vmatmul.f32.gmra.mxu1 %v1652_v27  ;;  %v1435_v24 = vpop.f32.mrf.mxu3  ;;  %v1626_v28 = vmul.f32 %v3502_v35, %v1594_v47  ;;  %v3650_v27 = vld [vmem:[#allocation3_spill] sm:$0xff] }
 0x35b   : > { %v1436_v10 = vadd.f32 %v1435_v24, %v1386_v52  ;;  %v1625_v5 = vmul.f32 %v3500_v56, %v1593_v36 }
 0x35c   : > { %v1658_v29 = vmax.f32 %v1626_v28, 0.001  ;;  %v3653_v28 = vld [vmem:[#allocation5_spill] sm:$0xff] }
 0x35d   : > { %v1470_v13 = vmax.f32 %v1436_v10, 1e-30  ;;  %v2580_v32 = vpop.eup %2579  ;;  %v1657_v42 = vmax.f32 %v1625_v5, 0.001 }
 0x35e   : > { %1963 = vmatmul.f32.gmra.mxu0 %v1651_v23  ;;  %v1532_v20 = vmul.f32 %v2580_v32, %v1468_v62  ;;  %v2582_v21 = vpop.eup %2581 }
 0x35f   : > { %2583 = vrcp.f32 %v1470_v13  ;;  %v1531_v49 = vmul.f32 %v2582_v21, %v1467_v15 }
 0x360   : > { %2585 = vrcp.f32 %v1469_v3  ;;  %v1564_v8 = vsub.f32 2.0, %v1532_v20 }
 0x361   : > { %v1563_v7 = vsub.f32 2.0, %v1531_v49 }
 0x362   : > { %2031 = vmatmul.f32.gmra.mxu1 %v1654_v39  ;;  %v1596_v41 = vmul.f32 %v2580_v32, %v1564_v8 }
 0x363   : > { %v1595_v61 = vmul.f32 %v2582_v21, %v1563_v7  ;;  %v3652_v21 = vld [vmem:[#allocation4_spill] sm:$0xff] }
 0x364   : > { %v1628_v11 = vmul.f32 %v3516_v30, %v1596_v41 }
 0x365   : > { %v2584_v43 = vpop.eup %2583  ;;  %v1627_v54 = vmul.f32 %v3514_v51, %v1595_v61 }
 0x366   : > { %1966 = vmatmul.f32.gmra.mxu0 %v1653_v40  ;;  %v1534_v1 = vmul.f32 %v2584_v43, %v1470_v13  ;;  %v2586_v26 = vpop.eup %2585  ;;  %v1660_v35 = vmax.f32 %v1628_v11, 0.001 }
 0x367   : > { %v1533_v46 = vmul.f32 %v2586_v26, %v1469_v3  ;;  %v1659_v6 = vmax.f32 %v1627_v54, 0.001 }
 0x368   : > { %v1566_v38 = vsub.f32 2.0, %v1534_v1 }
 0x369   : > { %v1565_v22 = vsub.f32 2.0, %v1533_v46 }
 0x36a   : > { %2034 = vmatmul.f32.gmra.mxu1 %v1656_v2  ;;  %v1598_v33 = vmul.f32 %v2584_v43, %v1566_v38 }
 0x36b   : > { %v1597_v56 = vmul.f32 %v2586_v26, %v1565_v22 }
 0x36c   : > { %v1630_v0 = vmul.f32 %v3650_v27, %v1598_v33 }
 0x36d   : > { %v1629_v37 = vmul.f32 %v3651_v14, %v1597_v56 }
 0x36e   : > { %1969 = vmatmul.f32.gmra.mxu0 %v1655_v57  ;;  %v1662_v25 = vmax.f32 %v1630_v0, 0.001 }
 0x36f   : > { %v1661_v62 = vmax.f32 %v1629_v37, 0.001 }
 0x372   : > { %2037 = vmatmul.f32.gmra.mxu1 %v1658_v29 }
 0x376   : > { %1972 = vmatmul.f32.gmra.mxu0 %v1657_v42  ;;  %v3654_v42 = vld [vmem:[#allocation6_spill] sm:$0xff] }
 0x37a   : > { %2040 = vmatmul.f32.gmra.mxu1 %v1660_v35 }
 0x37e   : > { %1975 = vmatmul.f32.gmra.mxu0 %v1659_v6 }
 0x382   : > { %2043 = vmatmul.f32.gmra.mxu1 %v1662_v25 }
 0x385   : > { %v1291_v59 = vpop.f32.mrf.mxu0 }
 0x386   : > { %1978 = vmatmul.f32.gmra.mxu0 %v1661_v62  ;;  %v1340_v30 = vpop.f32.mrf.mxu1 }
 0x387   : > { %v1341_v18 = vadd.f32 %v1340_v30, %v1291_v59 }
 0x389   : > { %v1471_v52 = vmax.f32 %v1341_v18, 1e-30 }
 0x38b   : > { %2587 = vrcp.f32 %v1471_v52  ;;  %v1389_v24 = vpop.f32.mrf.mxu2 }
 0x38c   : > { %v1438_v23 = vpop.f32.mrf.mxu3 }
 0x38d   : > { %v1439_v51 = vadd.f32 %v1438_v23, %v1389_v24  ;;  %v1293_v63 = vpop.f32.mrf.mxu0 }
 0x38e   : > { %v1342_v34 = vpop.f32.mrf.mxu1 }
 0x38f   : > { %v1472_v15 = vmax.f32 %v1439_v51, 1e-30  ;;  %v1343_v10 = vadd.f32 %v1342_v34, %v1293_v63 }
 0x391   : > { %v2588_v55 = vpop.eup %2587  ;;  %2589 = vrcp.f32 %v1472_v15  ;;  %v1473_v50 = vmax.f32 %v1343_v10, 1e-30 }
 0x392   : > { %v1535_v19 = vmul.f32 %v2588_v55, %v1471_v52 }
 0x393   : > { %2591 = vrcp.f32 %v1473_v50  ;;  %v1391_v48 = vpop.f32.mrf.mxu2 }
 0x394   : > { %v1567_v9 = vsub.f32 2.0, %v1535_v19  ;;  %v1440_v31 = vpop.f32.mrf.mxu3 }
 0x395   : > { %v1441_v60 = vadd.f32 %v1440_v31, %v1391_v48 }
 0x396   : > { %v1599_v39 = vmul.f32 %v2588_v55, %v1567_v9 }
 0x397   : > { %v2005_v58 = vpop.f32.mrf.mxu1  ;;  %v2590_v12 = vpop.eup %2589  ;;  %v1474_v13 = vmax.f32 %v1441_v60, 1e-30 }
 0x398   : > { %v1536_v17 = vmul.f32 %v2590_v12, %v1472_v15  ;;  %v1631_v53 = vmul.f32 %v3544_v44, %v1599_v39 }
 0x399   : > { %v2592_v40 = vpop.eup %2591  ;;  %2593 = vrcp.f32 %v1474_v13 }
 0x39a   : > { %v1568_v45 = vsub.f32 2.0, %v1536_v17  ;;  %v1537_v32 = vmul.f32 %v2592_v40, %v1473_v50  ;;  %v1663_v4 = vmax.f32 %v1631_v53, 0.001 }
 0x39b   : > { %v1940_v3 = vpop.f32.mrf.mxu0 }
 0x39c   : > { %v2006_v47 = vadd.f32 %v2005_v58, %v1940_v3  ;;  %v1600_v20 = vmul.f32 %v2590_v12, %v1568_v45  ;;  %v1569_v2 = vsub.f32 2.0, %v1537_v32  ;;  %1981 = vmatmul.f32.gmra.mxu0 %v1663_v4 }
 0x39e   : > { %2053 = vst [vmem:[%s3607_s16] sm:$0xff] %v2006_v47  ;;  %v1601_v44 = vmul.f32 %v2592_v40, %v1569_v2  ;;  %v1632_v36 = vmul.f32 %v3652_v21, %v1600_v20 }
 0x39f   : > { %v2008_v16 = vpop.f32.mrf.mxu1  ;;  %v2594_v49 = vpop.eup %2593 }
 0x3a0   : > { %v1538_v8 = vmul.f32 %v2594_v49, %v1474_v13  ;;  %v1664_v57 = vmax.f32 %v1632_v36, 0.001  ;;  %v1633_v43 = vmul.f32 %v3653_v28, %v1601_v44 }
 0x3a2   : > { %v1570_v5 = vsub.f32 2.0, %v1538_v8  ;;  %2046 = vmatmul.f32.gmra.mxu1 %v1664_v57  ;;  %v1665_v7 = vmax.f32 %v1633_v43, 0.001 }
 0x3a3   : > { %v1943_v41 = vpop.f32.mrf.mxu0 }
 0x3a4   : > { %v2009_v1 = vadd.f32 %v2008_v16, %v1943_v41  ;;  %v1602_v29 = vmul.f32 %v2594_v49, %v1570_v5  ;;  %1984 = vmatmul.f32.gmra.mxu0 %v1665_v7 }
 0x3a6   : > { %2054 = vst [vmem:[%s3607_s16 + $0x8] sm:$0xff] %v2009_v1  ;;  %v1634_v61 = vmul.f32 %v3654_v42, %v1602_v29 }
 0x3a7   : > { %v2011_v26 = vpop.f32.mrf.mxu1 }
 0x3a8   : > { %v1666_v46 = vmax.f32 %v1634_v61, 0.001 }
 0x3aa   : > { %2049 = vmatmul.f32.gmra.mxu1 %v1666_v46 }
 0x3ab   : > { %v1946_v38 = vpop.f32.mrf.mxu0 }
 0x3ac   : > { %v2012_v11 = vadd.f32 %v2011_v26, %v1946_v38 }
 0x3ae   : > { %2055 = vst [vmem:[%s3607_s16 + $0x10] sm:$0xff] %v2012_v11 }
 0x3af   : > { %v2014_v22 = vpop.f32.mrf.mxu1 }
 0x3b3   : > { %v1949_v33 = vpop.f32.mrf.mxu0 }
 0x3b4   : > { %v2015_v35 = vadd.f32 %v2014_v22, %v1949_v33 }
 0x3b6   : > { %2056 = vst [vmem:[%s3607_s16 + $0x18] sm:$0xff] %v2015_v35 }
 0x3b7   : > { %v2017_v54 = vpop.f32.mrf.mxu1 }
 0x3bb   : > { %v1952_v56 = vpop.f32.mrf.mxu0 }
 0x3bc   : > { %v2018_v6 = vadd.f32 %v2017_v54, %v1952_v56 }
 0x3be   : > { %2057 = vst [vmem:[%s3607_s16 + $0x20] sm:$0xff] %v2018_v6 }
 0x3bf   : > { %v2020_v27 = vpop.f32.mrf.mxu1 }
 0x3c3   : > { %v1955_v0 = vpop.f32.mrf.mxu0 }
 0x3c4   : > { %v2021_v25 = vadd.f32 %v2020_v27, %v1955_v0 }
 0x3c6   : > { %2058 = vst [vmem:[%s3607_s16 + $0x28] sm:$0xff] %v2021_v25 }
 0x3c7   : > { %v2023_v14 = vpop.f32.mrf.mxu1 }
 0x3cb   : > { %v1958_v37 = vpop.f32.mrf.mxu0 }
 0x3cc   : > { %v2024_v62 = vadd.f32 %v2023_v14, %v1958_v37 }
 0x3ce   : > { %2059 = vst [vmem:[%s3607_s16 + $0x30] sm:$0xff] %v2024_v62 }
 0x3cf   : > { %v2026_v59 = vpop.f32.mrf.mxu1 }
 0x3d3   : > { %v1961_v30 = vpop.f32.mrf.mxu0 }
 0x3d4   : > { %v2027_v18 = vadd.f32 %v2026_v59, %v1961_v30 }
 0x3d6   : > { %2060 = vst [vmem:[%s3607_s16 + $0x38] sm:$0xff] %v2027_v18 }
 0x3d7   : > { %v2029_v52 = vpop.f32.mrf.mxu1 }
 0x3db   : > { %v1964_v24 = vpop.f32.mrf.mxu0 }
 0x3dc   : > { %v2030_v23 = vadd.f32 %v2029_v52, %v1964_v24 }
 0x3de   : > { %2061 = vst [vmem:[%s3607_s16 + $0x40] sm:$0xff] %v2030_v23 }
 0x3df   : > { %v2032_v51 = vpop.f32.mrf.mxu1 }
 0x3e3   : > { %v1967_v63 = vpop.f32.mrf.mxu0 }
 0x3e4   : > { %v2033_v34 = vadd.f32 %v2032_v51, %v1967_v63 }
 0x3e6   : > { %2062 = vst [vmem:[%s3607_s16 + $0x48] sm:$0xff] %v2033_v34 }
 0x3e7   : > { %v2035_v15 = vpop.f32.mrf.mxu1 }
 0x3eb   : > { %v1970_v10 = vpop.f32.mrf.mxu0 }
 0x3ec   : > { %v2036_v55 = vadd.f32 %v2035_v15, %v1970_v10 }
 0x3ee   : > { %2063 = vst [vmem:[%s3607_s16 + $0x50] sm:$0xff] %v2036_v55 }
 0x3ef   : > { %v2038_v50 = vpop.f32.mrf.mxu1 }
 0x3f3   : > { %v1973_v19 = vpop.f32.mrf.mxu0 }
 0x3f4   : > { %v2039_v48 = vadd.f32 %v2038_v50, %v1973_v19 }
 0x3f6   : > { %2064 = vst [vmem:[%s3607_s16 + $0x58] sm:$0xff] %v2039_v48 }
 0x3f7   : > { %v2041_v9 = vpop.f32.mrf.mxu1 }
 0x3fb   : > { %v1976_v31 = vpop.f32.mrf.mxu0 }
 0x3fc   : > { %v2042_v60 = vadd.f32 %v2041_v9, %v1976_v31 }
 0x3fe   : > { %2065 = vst [vmem:[%s3607_s16 + $0x60] sm:$0xff] %v2042_v60 }
 0x3ff   : > { %v2044_v39 = vpop.f32.mrf.mxu1 }
 0x403   : > { %v1979_v58 = vpop.f32.mrf.mxu0 }
 0x404   : > { %v2045_v12 = vadd.f32 %v2044_v39, %v1979_v58 }
 0x406   : > { %2066 = vst [vmem:[%s3607_s16 + $0x68] sm:$0xff] %v2045_v12 }
 0x419   : > { %v1982_v13 = vpop.f32.mrf.mxu0 }
 0x41f   : > { %v2047_v17 = vpop.f32.mrf.mxu1 }
 0x420   : > { %v2048_v53 = vadd.f32 %v2047_v17, %v1982_v13 }
 0x421   : > { %v1985_v40 = vpop.f32.mrf.mxu0 }
 0x422   : > { %2067 = vst [vmem:[%s3607_s16 + $0x70] sm:$0xff] %v2048_v53 }
 0x427   : > { %v2050_v45 = vpop.f32.mrf.mxu1 }
 0x428   : > { %v2051_v32 = vadd.f32 %v2050_v45, %v1985_v40 }
 0x42a   : > { %2068 = vst [vmem:[%s3607_s16 + $0x78] sm:$0xff] %v2051_v32 }
 0x42b PF: > { %s18_s27 = sadd.s32 1, %s2601_s27  }
 0x42c   : > { %p15_p4 = scmp.ge.s32.totalorder %s18_s27, 4  }
 0x42e   :  { %17 = sbr.rel (!%p15_p4) target bundleno = 1 (0x1), region = 82 }

</bundles_post_ra>
